<compile_context>
chip_gen: v6e
topology: v6e:2x2x1
jax: 0.10.0
libtpu: 0.0.40
codegen_flags: <defaults>
</compile_context>

<pallas_src>
import jax
import jax.numpy as jnp
from jax.experimental import pallas as pl
from jax.experimental.pallas import tpu as pltpu


def _attention_kernel(dec_ref, enc_ref, w_dec_ref, w_enc_ref, b_ref, v_ref, out_ref):
    # dec_ref:   (tB, dec_hid)        last decoder layer, batch tile
    # enc_ref:   (S, tB, 2*enc_hid)   encoder outputs, native (seq, batch, feat)
    # w_dec_ref: (dec_hid, enc_hid)
    # w_enc_ref: (2*enc_hid, enc_hid)
    # b_ref:     (1, enc_hid)
    # v_ref:     (1, enc_hid)
    # out_ref:   (tB, S)
    S, tB, enc2 = enc_ref.shape
    E = w_enc_ref.shape[1]

    # Decoder half of the attn linear (+ bias): once per batch row, not per (b, s).
    dec_pre = (
        jnp.dot(dec_ref[...], w_dec_ref[...], preferred_element_type=jnp.float32)
        + b_ref[...]
    )                                                              # (tB, E)

    # Encoder half: flatten (S, tB) into the matmul M dimension -> one big MXU op.
    enc2d = enc_ref[...].reshape(S * tB, enc2)
    pre_enc = jnp.dot(enc2d, w_enc_ref[...], preferred_element_type=jnp.float32)
    pre = pre_enc.reshape(S, tB, E) + dec_pre[None, :, :]          # (S, tB, E)

    energy = jnp.tanh(pre)                                         # EUP

    # v-projection: contract enc_hid (lane axis) -> per-(s, b) score.
    # (v_b omitted: softmax is invariant to a constant shift.)
    scores = jnp.sum(energy * v_ref[...][None, :, :], axis=-1)     # (S, tB)

    # Transpose only the small score tile so the softmax reduction and the
    # output store run along the lane axis (lane-dense (tB, S) store).
    scores_t = scores.T                                            # (tB, S)
    m = jnp.max(scores_t, axis=-1, keepdims=True)
    e = jnp.exp(scores_t - m)
    denom = jnp.sum(e, axis=-1, keepdims=True)
    out_ref[...] = (e * pl.reciprocal(denom, approx=False)).astype(out_ref.dtype)


def _pick_batch_tile(batch):
    # Prefer small multiples of 8 so the grid has several steps (pipelining +
    # v7x two-core sharding); fall back to the full batch (always a legal block).
    for t in (8, 16, 32):
        if batch % t == 0:
            return t
    return batch


def attention_forward(decoder_hidden, encoder_outputs, w_attn, b_attn, v_w, v_b):
    """decoder_hidden: (L, B, dec_hid); encoder_outputs: (S, B, 2*enc_hid).
    w_attn: (enc_hid, attn_in) torch layout, attn_in = dec_hid + 2*enc_hid with
    concat order [dec, enc]; b_attn: (enc_hid,); v_w: (1, enc_hid); v_b: (1,).
    Returns (B, S) attention weights."""
    del v_b  # softmax is shift-invariant: the v bias cannot change the output.
    S, B, enc2 = encoder_outputs.shape
    dec_hid = decoder_hidden.shape[-1]
    enc_hid = w_attn.shape[0]

    dec = decoder_hidden[-1].astype(jnp.float32)                   # (B, dec_hid)
    # Split the torch-layout weight: first dec_hid input columns act on the
    # decoder state, the remaining 2*enc_hid on the encoder outputs.
    w_dec = jnp.transpose(w_attn[:, :dec_hid]).astype(jnp.float32)  # (dec_hid, E)
    w_enc = jnp.transpose(w_attn[:, dec_hid:]).astype(jnp.float32)  # (2*enc_hid, E)
    b_2d = b_attn.reshape(1, enc_hid).astype(jnp.float32)
    v_2d = v_w.reshape(1, enc_hid).astype(jnp.float32)

    tB = _pick_batch_tile(B)
    grid = (B // tB,)

    # Advisory cost estimate so XLA schedules the surrounding glue sensibly.
    flops = (2 * B * S * enc2 * enc_hid          # encoder matmul
             + 2 * B * dec_hid * enc_hid         # decoder matmul
             + 2 * B * S * enc_hid               # v projection
             + 5 * B * S)                        # softmax arithmetic
    transcendentals = B * S * enc_hid + B * S    # tanh + exp
    bytes_accessed = 4 * (S * B * enc2 + B * dec_hid
                          + (dec_hid + enc2 + 2) * enc_hid + B * S)

    return pl.pallas_call(
        _attention_kernel,
        out_shape=jax.ShapeDtypeStruct((B, S), jnp.float32),
        grid=grid,
        in_specs=[
            pl.BlockSpec((tB, dec_hid), lambda i: (i, 0)),          # dec (batch tile)
            pl.BlockSpec((S, tB, enc2), lambda i: (0, i, 0)),       # enc, native layout
            pl.BlockSpec((dec_hid, enc_hid), lambda i: (0, 0)),     # W_dec
            pl.BlockSpec((enc2, enc_hid), lambda i: (0, 0)),        # W_enc
            pl.BlockSpec((1, enc_hid), lambda i: (0, 0)),           # b_attn
            pl.BlockSpec((1, enc_hid), lambda i: (0, 0)),           # v weight
        ],
        out_specs=pl.BlockSpec((tB, S), lambda i: (i, 0)),
        compiler_params=pltpu.CompilerParams(
            dimension_semantics=("parallel",),
            vmem_limit_bytes=32 * 1024 * 1024,   # safe on v7x's smaller VMEM too
        ),
        cost_estimate=pl.CostEstimate(
            flops=flops, transcendentals=transcendentals, bytes_accessed=bytes_accessed
        ),
    )(dec, encoder_outputs, w_dec, w_enc, b_2d, v_2d)


def attention_reference(decoder_hidden, encoder_outputs, w_attn, b_attn, v_w, v_b):
    """Pure-JAX reference mirroring the PyTorch forward exactly."""
    S = encoder_outputs.shape[0]
    dec = decoder_hidden[-1][:, None, :]
    dec_rep = jnp.repeat(dec, S, axis=1)
    enc = jnp.transpose(encoder_outputs, (1, 0, 2))
    cat = jnp.concatenate([dec_rep, enc], axis=-1)
    energy = jnp.tanh(cat @ w_attn.T + b_attn)
    result = energy @ v_w.T + v_b                                   # (B, S, 1)
    final = jax.nn.softmax(result, axis=1)                          # softmax over seq
    return jnp.squeeze(final, axis=2)                               # (B, S)


if __name__ == "__main__":
    # enc_hid=16, dec_hid=32, L=2 decoder layers, B=16 (two batch tiles of 8),
    # S=128 so the output store is lane-dense.  Kernel is correct for other S
    # too (stores just become masked).
    enc_hid, dec_hid = 16, 32
    L, B, S = 2, 16, 128
    attn_in = 2 * enc_hid + dec_hid

    key = jax.random.PRNGKey(0)
    k1, k2, k3, k4, k5, k6 = jax.random.split(key, 6)

    decoder_hidden = jax.random.normal(k1, (L, B, dec_hid), dtype=jnp.float32)
    encoder_outputs = jax.random.normal(k2, (S, B, 2 * enc_hid), dtype=jnp.float32)

    # torch nn.Linear layout: weight (out_features, in_features)
    w_attn = jax.random.normal(k3, (enc_hid, attn_in), dtype=jnp.float32) * 0.1
    b_attn = jax.random.normal(k4, (enc_hid,), dtype=jnp.float32) * 0.1
    v_w = jax.random.normal(k5, (1, enc_hid), dtype=jnp.float32) * 0.1
    v_b = jax.random.normal(k6, (1,), dtype=jnp.float32) * 0.1

    out = attention_forward(decoder_hidden, encoder_outputs, w_attn, b_attn, v_w, v_b)
    out = jax.block_until_ready(out)

    ref = attention_reference(decoder_hidden, encoder_outputs, w_attn, b_attn, v_w, v_b)
    assert out.shape == (B, S), out.shape
    assert jnp.allclose(out, ref, atol=1e-5, rtol=1e-5), "mismatch vs reference"
    assert jnp.allclose(jnp.sum(out, axis=-1), 1.0, atol=1e-5), "softmax rows must sum to 1"

    print("KERNEL_OK")
</pallas_src>

<mosaic_0001>
module attributes {stable_mosaic.version = 11 : i64} {
  func.func @_attention_kernel(%arg0: i32, %arg1: memref<8x32xf32, #tpu.memory_space<vmem>>, %arg2: memref<128x8x32xf32, #tpu.memory_space<vmem>>, %arg3: memref<32x16xf32, #tpu.memory_space<vmem>>, %arg4: memref<32x16xf32, #tpu.memory_space<vmem>>, %arg5: memref<1x16xf32, #tpu.memory_space<vmem>>, %arg6: memref<1x16xf32, #tpu.memory_space<vmem>>, %arg7: memref<8x128xf32, #tpu.memory_space<vmem>>) attributes {dimension_semantics = [#tpu.dimension_semantics<parallel>], iteration_bounds = array<i64: 2>, scalar_prefetch = 0 : i64, scratch_operands = 0 : i64, tpu.core_type = #tpu.core_type<tc>, window_params = [{transform_indices = @transform_0, window_bounds = array<i64: 8, 32>}, {transform_indices = @transform_1, window_bounds = array<i64: 128, 8, 32>}, {pipeline_mode = #tpu.pipeline_mode<synchronous>, transform_indices = @transform_2, window_bounds = array<i64: 32, 16>}, {pipeline_mode = #tpu.pipeline_mode<synchronous>, transform_indices = @transform_3, window_bounds = array<i64: 32, 16>}, {pipeline_mode = #tpu.pipeline_mode<synchronous>, transform_indices = @transform_4, window_bounds = array<i64: 1, 16>}, {pipeline_mode = #tpu.pipeline_mode<synchronous>, transform_indices = @transform_5, window_bounds = array<i64: 1, 16>}, {transform_indices = @transform_6, window_bounds = array<i64: 8, 128>}]} {
    %c0 = arith.constant 0 : index
    %c0_0 = arith.constant 0 : index
    %0 = vector.load %arg1[%c0, %c0_0] : memref<8x32xf32, #tpu.memory_space<vmem>>, vector<8x32xf32>
    %c0_1 = arith.constant 0 : index
    %c0_2 = arith.constant 0 : index
    %1 = vector.load %arg3[%c0_1, %c0_2] : memref<32x16xf32, #tpu.memory_space<vmem>>, vector<32x16xf32>
    %cst = arith.constant dense<0.000000e+00> : vector<8x16xf32>
    %2 = tpu.matmul %0, %1, %cst {dimension_numbers = #tpu.dot_dimension_numbers<[1], [0], [0], [1], [0, 0, 1, 1], [], []>} : vector<8x32xf32>, vector<32x16xf32>, vector<8x16xf32> -> vector<8x16xf32>
    %c0_3 = arith.constant 0 : index
    %c0_4 = arith.constant 0 : index
    %3 = vector.load %arg5[%c0_3, %c0_4] : memref<1x16xf32, #tpu.memory_space<vmem>>, vector<1x16xf32>
    %4 = vector.broadcast %3 : vector<1x16xf32> to vector<8x16xf32>
    %5 = arith.addf %2, %4 : vector<8x16xf32>
    %c0_5 = arith.constant 0 : index
    %c0_6 = arith.constant 0 : index
    %c0_7 = arith.constant 0 : index
    %6 = vector.load %arg2[%c0_5, %c0_6, %c0_7] : memref<128x8x32xf32, #tpu.memory_space<vmem>>, vector<128x8x32xf32>
    %7 = vector.shape_cast %6 : vector<128x8x32xf32> to vector<1024x32xf32>
    %c0_8 = arith.constant 0 : index
    %c0_9 = arith.constant 0 : index
    %8 = vector.load %arg4[%c0_8, %c0_9] : memref<32x16xf32, #tpu.memory_space<vmem>>, vector<32x16xf32>
    %cst_10 = arith.constant dense<0.000000e+00> : vector<1024x16xf32>
    %9 = tpu.matmul %7, %8, %cst_10 {dimension_numbers = #tpu.dot_dimension_numbers<[1], [0], [0], [1], [0, 0, 1, 1], [], []>} : vector<1024x32xf32>, vector<32x16xf32>, vector<1024x16xf32> -> vector<1024x16xf32>
    %10 = vector.shape_cast %9 : vector<1024x16xf32> to vector<128x8x16xf32>
    %11 = vector.shape_cast %5 : vector<8x16xf32> to vector<1x8x16xf32>
    %12 = vector.broadcast %11 : vector<1x8x16xf32> to vector<128x8x16xf32>
    %13 = arith.addf %10, %12 : vector<128x8x16xf32>
    %14 = math.tanh %13 : vector<128x8x16xf32>
    %c0_11 = arith.constant 0 : index
    %c0_12 = arith.constant 0 : index
    %15 = vector.load %arg6[%c0_11, %c0_12] : memref<1x16xf32, #tpu.memory_space<vmem>>, vector<1x16xf32>
    %16 = vector.shape_cast %15 : vector<1x16xf32> to vector<1x1x16xf32>
    %17 = vector.broadcast %16 : vector<1x1x16xf32> to vector<128x8x16xf32>
    %18 = arith.mulf %14, %17 : vector<128x8x16xf32>
    %cst_13 = arith.constant dense<0.000000e+00> : vector<128x8xf32>
    %19 = vector.multi_reduction <add>, %18, %cst_13 [2] : vector<128x8x16xf32> to vector<128x8xf32>
    %20 = tpu.transpose %19, [1, 0] : vector<128x8xf32> -> vector<8x128xf32>
    %cst_14 = arith.constant dense<0xFF800000> : vector<8xf32>
    %21 = vector.multi_reduction <maximumf>, %20, %cst_14 [1] : vector<8x128xf32> to vector<8xf32>
    %22 = vector.shape_cast %21 : vector<8xf32> to vector<8x1xf32>
    %23 = vector.broadcast %22 : vector<8x1xf32> to vector<8x128xf32>
    %24 = arith.subf %20, %23 : vector<8x128xf32>
    %25 = math.exp %24 : vector<8x128xf32>
    %cst_15 = arith.constant dense<0.000000e+00> : vector<8xf32>
    %26 = vector.multi_reduction <add>, %25, %cst_15 [1] : vector<8x128xf32> to vector<8xf32>
    %27 = vector.shape_cast %26 : vector<8xf32> to vector<8x1xf32>
    %28 = tpu.reciprocal %27 : vector<8x1xf32> -> vector<8x1xf32>
    %29 = vector.broadcast %28 : vector<8x1xf32> to vector<8x128xf32>
    %30 = arith.mulf %25, %29 : vector<8x128xf32>
    %c0_16 = arith.constant 0 : index
    %c0_17 = arith.constant 0 : index
    %31 = vector.load %arg7[%c0_16, %c0_17] : memref<8x128xf32, #tpu.memory_space<vmem>>, vector<8x128xf32>
    tpu.vector_store %arg7[%c0_16, %c0_17], %30 {strides = array<i32>} : memref<8x128xf32, #tpu.memory_space<vmem>>, vector<8x128xf32>,
    return
  }
  func.func @transform_0(%arg0: i32) -> (i32, i32) {
    %c0_i32 = arith.constant 0 : i32
    %c0_i32_0 = arith.constant 0 : i32
    return %arg0, %c0_i32 : i32, i32
  }
  func.func @transform_1(%arg0: i32) -> (i32, i32, i32) {
    %c0_i32 = arith.constant 0 : i32
    %c0_i32_0 = arith.constant 0 : i32
    %c0_i32_1 = arith.constant 0 : i32
    return %c0_i32, %arg0, %c0_i32_0 : i32, i32, i32
  }
  func.func @transform_2(%arg0: i32) -> (i32, i32) {
    %c0_i32 = arith.constant 0 : i32
    %c0_i32_0 = arith.constant 0 : i32
    %c0_i32_1 = arith.constant 0 : i32
    return %c0_i32, %c0_i32_0 : i32, i32
  }
  func.func @transform_3(%arg0: i32) -> (i32, i32) {
    %c0_i32 = arith.constant 0 : i32
    %c0_i32_0 = arith.constant 0 : i32
    %c0_i32_1 = arith.constant 0 : i32
    return %c0_i32, %c0_i32_0 : i32, i32
  }
  func.func @transform_4(%arg0: i32) -> (i32, i32) {
    %c0_i32 = arith.constant 0 : i32
    %c0_i32_0 = arith.constant 0 : i32
    %c0_i32_1 = arith.constant 0 : i32
    return %c0_i32, %c0_i32_0 : i32, i32
  }
  func.func @transform_5(%arg0: i32) -> (i32, i32) {
    %c0_i32 = arith.constant 0 : i32
    %c0_i32_0 = arith.constant 0 : i32
    %c0_i32_1 = arith.constant 0 : i32
    return %c0_i32, %c0_i32_0 : i32, i32
  }
  func.func @transform_6(%arg0: i32) -> (i32, i32) {
    %c0_i32 = arith.constant 0 : i32
    %c0_i32_0 = arith.constant 0 : i32
    return %arg0, %c0_i32 : i32, i32
  }
}

</mosaic_0001>

<bundles_post_ra>
// kernel: tpu_custom_call.1
= control target key start
LH: loop header
LB: loop body
LE: loop exit
PB: predicated region body
PF: predicated region fallthrough
CT: control target
= control target key end

     0   :  { %11 = vsyncpa [#allocation4], 0  ;;  %s6219_s0 = inlined_call_operand.vmem [shape: f32[16,32], index: 0, kind: input, shape index: {}]   ;;  %s6220_s1 = inlined_call_operand.vmem [shape: f32[128,16,32], index: 1, kind: input, shape index: {}]   ;;  %s6221_s2 = inlined_call_operand.vmem [shape: f32[32,16], index: 2, kind: input, shape index: {}]   ;;  %s6222_s3 = inlined_call_operand.vmem [shape: f32[32,16], index: 3, kind: input, shape index: {}]   ;;  %s6223_s4 = inlined_call_operand.vmem [shape: f32[1,16], index: 4, kind: input, shape index: {}]   ;;  %s6224_s5 = inlined_call_operand.vmem [shape: f32[1,16], index: 5, kind: input, shape index: {}]   ;;  %s6225_s6 = inlined_call_operand.hbm [shape: f32[16,128], index: 6, kind: output, shape index: {}]  }
   0x1   :  { %13 = vsyncpa [#allocation4 + $0x1], 0  ;;  %s4705_s21 = smov 0   ;;  %s4707_s22 = smov 0  }
   0x2   :  { %s4709_s23 = smov 0   ;;  %s4711_s24 = smov 0  }
   0x3 LB: > { %s4726_s25 = sadd.s32 4294967295, %s4665_s24   ;;  %s3803_s26 = sadd.s32 4294967294, %s4665_s24   ;;  %s4665_s24 = sphi %s4711_s24, %s6233_s24   ;;  %s4661_s23 = sphi %s4709_s23, %s6232_s23   ;;  %s4657_s22 = sphi %s4707_s22, %s6231_s22   ;;  %s4653_s21 = sphi %s4705_s21, %s6230_s21  }
   0x4   : > { %s4730_s27 = sadd.s32 1, %s4665_s24   ;;  %s52_s28 = sadd.s32 1, %s4661_s23 }
   0x5   : > { %s49_s29 = ssub.s32 %s4665_s24, %s4730_s27  ;;  %p59_p0 = scmp.ne.s32.totalorder %s4661_s23, %s4657_s22 }
   0x6   : > { %p50_p1 = scmp.eq.s32.totalorder %s49_s29, 0  ;;  %p60_p2 = scmp.eq.s32.totalorder %s4665_s24, 0 }
   0x7   : > { %p173_p3 = scmp.eq.s32.totalorder %s4726_s25, 1  ;;  %p178_p4 = scmp.ne.s32.totalorder %s4657_s22, %s4653_s21 }
   0x8   : > { %s4742_s30 = scalar_select %p50_p1, %s4661_s23, %s52_s28  }
   0x9   : > { %p61_p5 = por %p60_p2, %p59_p0  ;;  %p4744_p6 = por %p173_p3, %p59_p0 }
   0xa   : > { %p179_p7 = scmp.eq.s32.totalorder %s3803_s26, 1  ;;  %p6226_p9 = scmp.ge.s32.totalorder %s4665_s24, 2 }
   0xc   : > { %p4748_p8 = por %p179_p7, %p178_p4  ;;  %207 = sbr.rel (%p6226_p9) target bundleno = 85 (0x55), region = 32 }
  0x11   : > { %217 = sbr.rel (!%p61_p5) target bundleno = 85 (0x55), region = 40  ;;  %s219_s9 = sand.u32 (%p61_p5), 1, %s4661_s23  }
  0x12   : > { %s3807_s10 = sshll.u32 (%p61_p5), %s4665_s24, 3  ;;  %s3806_s11 = sshll.u32 (%p61_p5), %s219_s9, 10 }
  0x13   : > { %s4760_s14 = scalar_lea.vmem (%p61_p5), %s6220_s1, %s3807_s10  ;;  %s4765_s15 = scalar_lea.vmem (%p61_p5), [#allocation2], %s3806_s11 }
  0x14   : > { %v506_v0 = vld [vmem:[%s4760_s14] sm:$0xff] (%p61_p5)  ;;  %v508_v1 = vld [vmem:[%s4760_s14 + $0x10] sm:$0xff] (%p61_p5) }
  0x15   : > { %v510_v2 = vld [vmem:[%s4760_s14 + $0x20] sm:$0xff] (%p61_p5)  ;;  %507 = vst [vmem:[%s4765_s15] sm:$0xff] (%p61_p5), %v506_v0  ;;  %509 = vst [vmem:[%s4765_s15 + $0x8] sm:$0xff] (%p61_p5), %v508_v1  ;;  %v512_v3 = vld [vmem:[%s4760_s14 + $0x30] sm:$0xff] (%p61_p5) }
  0x16   : > { %511 = vst [vmem:[%s4765_s15 + $0x10] sm:$0xff] %v510_v2  ;;  %v514_v4 = vld [vmem:[%s4760_s14 + $0x40] sm:$0xff]  ;;  %v516_v5 = vld [vmem:[%s4760_s14 + $0x50] sm:$0xff]  ;;  %513 = vst [vmem:[%s4765_s15 + $0x18] sm:$0xff] %v512_v3 }
  0x17   : > { %515 = vst [vmem:[%s4765_s15 + $0x20] sm:$0xff] %v514_v4  ;;  %517 = vst [vmem:[%s4765_s15 + $0x28] sm:$0xff] %v516_v5  ;;  %v518_v6 = vld [vmem:[%s4760_s14 + $0x60] sm:$0xff]  ;;  %v520_v7 = vld [vmem:[%s4760_s14 + $0x70] sm:$0xff] }
  0x18   : > { %v522_v8 = vld [vmem:[%s4760_s14 + $0x80] sm:$0xff]  ;;  %519 = vst [vmem:[%s4765_s15 + $0x30] sm:$0xff] %v518_v6  ;;  %521 = vst [vmem:[%s4765_s15 + $0x38] sm:$0xff] %v520_v7  ;;  %v524_v9 = vld [vmem:[%s4760_s14 + $0x90] sm:$0xff] }
  0x19   : > { %523 = vst [vmem:[%s4765_s15 + $0x40] sm:$0xff] %v522_v8  ;;  %v526_v10 = vld [vmem:[%s4760_s14 + $0xa0] sm:$0xff]  ;;  %v528_v11 = vld [vmem:[%s4760_s14 + $0xb0] sm:$0xff]  ;;  %525 = vst [vmem:[%s4765_s15 + $0x48] sm:$0xff] %v524_v9 }
  0x1a   : > { %527 = vst [vmem:[%s4765_s15 + $0x50] sm:$0xff] %v526_v10  ;;  %529 = vst [vmem:[%s4765_s15 + $0x58] sm:$0xff] %v528_v11  ;;  %v530_v12 = vld [vmem:[%s4760_s14 + $0xc0] sm:$0xff]  ;;  %v532_v13 = vld [vmem:[%s4760_s14 + $0xd0] sm:$0xff] }
  0x1b   : > { %v534_v14 = vld [vmem:[%s4760_s14 + $0xe0] sm:$0xff]  ;;  %531 = vst [vmem:[%s4765_s15 + $0x60] sm:$0xff] %v530_v12  ;;  %533 = vst [vmem:[%s4765_s15 + $0x68] sm:$0xff] %v532_v13  ;;  %v536_v15 = vld [vmem:[%s4760_s14 + $0xf0] sm:$0xff] }
  0x1c   : > { %535 = vst [vmem:[%s4765_s15 + $0x70] sm:$0xff] %v534_v14  ;;  %v538_v16 = vld [vmem:[%s4760_s14 + $0x100] sm:$0xff]  ;;  %v540_v17 = vld [vmem:[%s4760_s14 + $0x110] sm:$0xff]  ;;  %537 = vst [vmem:[%s4765_s15 + $0x78] sm:$0xff] %v536_v15 }
  0x1d   : > { %539 = vst [vmem:[%s4765_s15 + $0x80] sm:$0xff] %v538_v16  ;;  %541 = vst [vmem:[%s4765_s15 + $0x88] sm:$0xff] %v540_v17  ;;  %v542_v18 = vld [vmem:[%s4760_s14 + $0x120] sm:$0xff]  ;;  %v544_v19 = vld [vmem:[%s4760_s14 + $0x130] sm:$0xff] }
  0x1e   : > { %v546_v20 = vld [vmem:[%s4760_s14 + $0x140] sm:$0xff]  ;;  %543 = vst [vmem:[%s4765_s15 + $0x90] sm:$0xff] %v542_v18  ;;  %545 = vst [vmem:[%s4765_s15 + $0x98] sm:$0xff] %v544_v19  ;;  %v548_v21 = vld [vmem:[%s4760_s14 + $0x150] sm:$0xff] }
  0x1f   : > { %547 = vst [vmem:[%s4765_s15 + $0xa0] sm:$0xff] %v546_v20  ;;  %v550_v22 = vld [vmem:[%s4760_s14 + $0x160] sm:$0xff]  ;;  %v552_v23 = vld [vmem:[%s4760_s14 + $0x170] sm:$0xff]  ;;  %549 = vst [vmem:[%s4765_s15 + $0xa8] sm:$0xff] %v548_v21 }
  0x20   : > { %551 = vst [vmem:[%s4765_s15 + $0xb0] sm:$0xff] %v550_v22  ;;  %553 = vst [vmem:[%s4765_s15 + $0xb8] sm:$0xff] %v552_v23  ;;  %v554_v24 = vld [vmem:[%s4760_s14 + $0x180] sm:$0xff]  ;;  %v556_v25 = vld [vmem:[%s4760_s14 + $0x190] sm:$0xff] }
  0x21   : > { %v558_v26 = vld [vmem:[%s4760_s14 + $0x1a0] sm:$0xff]  ;;  %555 = vst [vmem:[%s4765_s15 + $0xc0] sm:$0xff] %v554_v24  ;;  %557 = vst [vmem:[%s4765_s15 + $0xc8] sm:$0xff] %v556_v25  ;;  %v560_v27 = vld [vmem:[%s4760_s14 + $0x1b0] sm:$0xff] }
  0x22   : > { %559 = vst [vmem:[%s4765_s15 + $0xd0] sm:$0xff] %v558_v26  ;;  %v562_v28 = vld [vmem:[%s4760_s14 + $0x1c0] sm:$0xff]  ;;  %v564_v29 = vld [vmem:[%s4760_s14 + $0x1d0] sm:$0xff]  ;;  %561 = vst [vmem:[%s4765_s15 + $0xd8] sm:$0xff] %v560_v27 }
  0x23   : > { %563 = vst [vmem:[%s4765_s15 + $0xe0] sm:$0xff] %v562_v28  ;;  %565 = vst [vmem:[%s4765_s15 + $0xe8] sm:$0xff] %v564_v29  ;;  %v566_v30 = vld [vmem:[%s4760_s14 + $0x1e0] sm:$0xff]  ;;  %v568_v31 = vld [vmem:[%s4760_s14 + $0x1f0] sm:$0xff] }
  0x24   : > { %v570_v32 = vld [vmem:[%s4760_s14 + $0x200] sm:$0xff]  ;;  %567 = vst [vmem:[%s4765_s15 + $0xf0] sm:$0xff] %v566_v30  ;;  %569 = vst [vmem:[%s4765_s15 + $0xf8] sm:$0xff] %v568_v31  ;;  %v572_v33 = vld [vmem:[%s4760_s14 + $0x210] sm:$0xff] }
  0x25   : > { %571 = vst [vmem:[%s4765_s15 + $0x100] sm:$0xff] %v570_v32  ;;  %v574_v34 = vld [vmem:[%s4760_s14 + $0x220] sm:$0xff]  ;;  %v576_v35 = vld [vmem:[%s4760_s14 + $0x230] sm:$0xff]  ;;  %573 = vst [vmem:[%s4765_s15 + $0x108] sm:$0xff] %v572_v33 }
  0x26   : > { %575 = vst [vmem:[%s4765_s15 + $0x110] sm:$0xff] %v574_v34  ;;  %577 = vst [vmem:[%s4765_s15 + $0x118] sm:$0xff] %v576_v35  ;;  %v578_v36 = vld [vmem:[%s4760_s14 + $0x240] sm:$0xff]  ;;  %v580_v37 = vld [vmem:[%s4760_s14 + $0x250] sm:$0xff] }
  0x27   : > { %v582_v38 = vld [vmem:[%s4760_s14 + $0x260] sm:$0xff]  ;;  %579 = vst [vmem:[%s4765_s15 + $0x120] sm:$0xff] %v578_v36  ;;  %581 = vst [vmem:[%s4765_s15 + $0x128] sm:$0xff] %v580_v37  ;;  %v584_v39 = vld [vmem:[%s4760_s14 + $0x270] sm:$0xff] }
  0x28   : > { %583 = vst [vmem:[%s4765_s15 + $0x130] sm:$0xff] %v582_v38  ;;  %v586_v40 = vld [vmem:[%s4760_s14 + $0x280] sm:$0xff]  ;;  %v588_v41 = vld [vmem:[%s4760_s14 + $0x290] sm:$0xff]  ;;  %585 = vst [vmem:[%s4765_s15 + $0x138] sm:$0xff] %v584_v39 }
  0x29   : > { %587 = vst [vmem:[%s4765_s15 + $0x140] sm:$0xff] %v586_v40  ;;  %589 = vst [vmem:[%s4765_s15 + $0x148] sm:$0xff] %v588_v41  ;;  %v590_v42 = vld [vmem:[%s4760_s14 + $0x2a0] sm:$0xff]  ;;  %v592_v43 = vld [vmem:[%s4760_s14 + $0x2b0] sm:$0xff] }
  0x2a   : > { %v594_v44 = vld [vmem:[%s4760_s14 + $0x2c0] sm:$0xff]  ;;  %591 = vst [vmem:[%s4765_s15 + $0x150] sm:$0xff] %v590_v42  ;;  %593 = vst [vmem:[%s4765_s15 + $0x158] sm:$0xff] %v592_v43  ;;  %v596_v45 = vld [vmem:[%s4760_s14 + $0x2d0] sm:$0xff] }
  0x2b   : > { %595 = vst [vmem:[%s4765_s15 + $0x160] sm:$0xff] %v594_v44  ;;  %v598_v46 = vld [vmem:[%s4760_s14 + $0x2e0] sm:$0xff]  ;;  %v600_v47 = vld [vmem:[%s4760_s14 + $0x2f0] sm:$0xff]  ;;  %597 = vst [vmem:[%s4765_s15 + $0x168] sm:$0xff] %v596_v45 }
  0x2c   : > { %599 = vst [vmem:[%s4765_s15 + $0x170] sm:$0xff] %v598_v46  ;;  %601 = vst [vmem:[%s4765_s15 + $0x178] sm:$0xff] %v600_v47  ;;  %v602_v48 = vld [vmem:[%s4760_s14 + $0x300] sm:$0xff]  ;;  %v604_v49 = vld [vmem:[%s4760_s14 + $0x310] sm:$0xff] }
  0x2d   : > { %v606_v50 = vld [vmem:[%s4760_s14 + $0x320] sm:$0xff]  ;;  %603 = vst [vmem:[%s4765_s15 + $0x180] sm:$0xff] %v602_v48  ;;  %605 = vst [vmem:[%s4765_s15 + $0x188] sm:$0xff] %v604_v49  ;;  %v608_v51 = vld [vmem:[%s4760_s14 + $0x330] sm:$0xff] }
  0x2e   : > { %607 = vst [vmem:[%s4765_s15 + $0x190] sm:$0xff] %v606_v50  ;;  %v610_v52 = vld [vmem:[%s4760_s14 + $0x340] sm:$0xff]  ;;  %v612_v53 = vld [vmem:[%s4760_s14 + $0x350] sm:$0xff]  ;;  %609 = vst [vmem:[%s4765_s15 + $0x198] sm:$0xff] %v608_v51 }
  0x2f   : > { %611 = vst [vmem:[%s4765_s15 + $0x1a0] sm:$0xff] %v610_v52  ;;  %613 = vst [vmem:[%s4765_s15 + $0x1a8] sm:$0xff] %v612_v53  ;;  %v614_v54 = vld [vmem:[%s4760_s14 + $0x360] sm:$0xff]  ;;  %v616_v55 = vld [vmem:[%s4760_s14 + $0x370] sm:$0xff] }
  0x30   : > { %v618_v56 = vld [vmem:[%s4760_s14 + $0x380] sm:$0xff]  ;;  %615 = vst [vmem:[%s4765_s15 + $0x1b0] sm:$0xff] %v614_v54  ;;  %617 = vst [vmem:[%s4765_s15 + $0x1b8] sm:$0xff] %v616_v55  ;;  %v620_v57 = vld [vmem:[%s4760_s14 + $0x390] sm:$0xff] }
  0x31   : > { %619 = vst [vmem:[%s4765_s15 + $0x1c0] sm:$0xff] %v618_v56  ;;  %v622_v58 = vld [vmem:[%s4760_s14 + $0x3a0] sm:$0xff]  ;;  %v624_v59 = vld [vmem:[%s4760_s14 + $0x3b0] sm:$0xff]  ;;  %621 = vst [vmem:[%s4765_s15 + $0x1c8] sm:$0xff] %v620_v57 }
  0x32   : > { %623 = vst [vmem:[%s4765_s15 + $0x1d0] sm:$0xff] %v622_v58  ;;  %625 = vst [vmem:[%s4765_s15 + $0x1d8] sm:$0xff] %v624_v59  ;;  %v626_v60 = vld [vmem:[%s4760_s14 + $0x3c0] sm:$0xff]  ;;  %v628_v61 = vld [vmem:[%s4760_s14 + $0x3d0] sm:$0xff] }
  0x33   : > { %v630_v62 = vld [vmem:[%s4760_s14 + $0x3e0] sm:$0xff]  ;;  %627 = vst [vmem:[%s4765_s15 + $0x1e0] sm:$0xff] %v626_v60  ;;  %629 = vst [vmem:[%s4765_s15 + $0x1e8] sm:$0xff] %v628_v61  ;;  %v632_v63 = vld [vmem:[%s4760_s14 + $0x3f0] sm:$0xff] }
  0x34   : > { %631 = vst [vmem:[%s4765_s15 + $0x1f0] sm:$0xff] %v630_v62  ;;  %v634_v0 = vld [vmem:[%s4760_s14 + $0x400] sm:$0xff]  ;;  %v636_v1 = vld [vmem:[%s4760_s14 + $0x410] sm:$0xff]  ;;  %633 = vst [vmem:[%s4765_s15 + $0x1f8] sm:$0xff] %v632_v63 }
  0x35   : > { %635 = vst [vmem:[%s4765_s15 + $0x200] sm:$0xff] %v634_v0  ;;  %637 = vst [vmem:[%s4765_s15 + $0x208] sm:$0xff] %v636_v1  ;;  %v638_v2 = vld [vmem:[%s4760_s14 + $0x420] sm:$0xff]  ;;  %v640_v3 = vld [vmem:[%s4760_s14 + $0x430] sm:$0xff] }
  0x36   : > { %v642_v4 = vld [vmem:[%s4760_s14 + $0x440] sm:$0xff]  ;;  %639 = vst [vmem:[%s4765_s15 + $0x210] sm:$0xff] %v638_v2  ;;  %641 = vst [vmem:[%s4765_s15 + $0x218] sm:$0xff] %v640_v3  ;;  %v644_v5 = vld [vmem:[%s4760_s14 + $0x450] sm:$0xff] }
  0x37   : > { %643 = vst [vmem:[%s4765_s15 + $0x220] sm:$0xff] %v642_v4  ;;  %v646_v6 = vld [vmem:[%s4760_s14 + $0x460] sm:$0xff]  ;;  %v648_v7 = vld [vmem:[%s4760_s14 + $0x470] sm:$0xff]  ;;  %645 = vst [vmem:[%s4765_s15 + $0x228] sm:$0xff] %v644_v5 }
  0x38   : > { %647 = vst [vmem:[%s4765_s15 + $0x230] sm:$0xff] %v646_v6  ;;  %649 = vst [vmem:[%s4765_s15 + $0x238] sm:$0xff] %v648_v7  ;;  %v650_v8 = vld [vmem:[%s4760_s14 + $0x480] sm:$0xff]  ;;  %v652_v9 = vld [vmem:[%s4760_s14 + $0x490] sm:$0xff] }
  0x39   : > { %v654_v10 = vld [vmem:[%s4760_s14 + $0x4a0] sm:$0xff]  ;;  %651 = vst [vmem:[%s4765_s15 + $0x240] sm:$0xff] %v650_v8  ;;  %653 = vst [vmem:[%s4765_s15 + $0x248] sm:$0xff] %v652_v9  ;;  %v656_v11 = vld [vmem:[%s4760_s14 + $0x4b0] sm:$0xff] }
  0x3a   : > { %655 = vst [vmem:[%s4765_s15 + $0x250] sm:$0xff] %v654_v10  ;;  %v658_v12 = vld [vmem:[%s4760_s14 + $0x4c0] sm:$0xff]  ;;  %v660_v13 = vld [vmem:[%s4760_s14 + $0x4d0] sm:$0xff]  ;;  %657 = vst [vmem:[%s4765_s15 + $0x258] sm:$0xff] %v656_v11 }
  0x3b   : > { %659 = vst [vmem:[%s4765_s15 + $0x260] sm:$0xff] %v658_v12  ;;  %661 = vst [vmem:[%s4765_s15 + $0x268] sm:$0xff] %v660_v13  ;;  %v662_v14 = vld [vmem:[%s4760_s14 + $0x4e0] sm:$0xff]  ;;  %v664_v15 = vld [vmem:[%s4760_s14 + $0x4f0] sm:$0xff] }
  0x3c   : > { %v666_v16 = vld [vmem:[%s4760_s14 + $0x500] sm:$0xff]  ;;  %663 = vst [vmem:[%s4765_s15 + $0x270] sm:$0xff] %v662_v14  ;;  %665 = vst [vmem:[%s4765_s15 + $0x278] sm:$0xff] %v664_v15  ;;  %v668_v17 = vld [vmem:[%s4760_s14 + $0x510] sm:$0xff] }
  0x3d   : > { %667 = vst [vmem:[%s4765_s15 + $0x280] sm:$0xff] %v666_v16  ;;  %v670_v18 = vld [vmem:[%s4760_s14 + $0x520] sm:$0xff]  ;;  %v672_v19 = vld [vmem:[%s4760_s14 + $0x530] sm:$0xff]  ;;  %669 = vst [vmem:[%s4765_s15 + $0x288] sm:$0xff] %v668_v17 }
  0x3e   : > { %671 = vst [vmem:[%s4765_s15 + $0x290] sm:$0xff] %v670_v18  ;;  %673 = vst [vmem:[%s4765_s15 + $0x298] sm:$0xff] %v672_v19  ;;  %v674_v20 = vld [vmem:[%s4760_s14 + $0x540] sm:$0xff]  ;;  %v676_v21 = vld [vmem:[%s4760_s14 + $0x550] sm:$0xff] }
  0x3f   : > { %v678_v22 = vld [vmem:[%s4760_s14 + $0x560] sm:$0xff]  ;;  %675 = vst [vmem:[%s4765_s15 + $0x2a0] sm:$0xff] %v674_v20  ;;  %677 = vst [vmem:[%s4765_s15 + $0x2a8] sm:$0xff] %v676_v21  ;;  %v680_v23 = vld [vmem:[%s4760_s14 + $0x570] sm:$0xff] }
  0x40   : > { %679 = vst [vmem:[%s4765_s15 + $0x2b0] sm:$0xff] %v678_v22  ;;  %v682_v24 = vld [vmem:[%s4760_s14 + $0x580] sm:$0xff]  ;;  %v684_v25 = vld [vmem:[%s4760_s14 + $0x590] sm:$0xff]  ;;  %681 = vst [vmem:[%s4765_s15 + $0x2b8] sm:$0xff] %v680_v23 }
  0x41   : > { %683 = vst [vmem:[%s4765_s15 + $0x2c0] sm:$0xff] %v682_v24  ;;  %685 = vst [vmem:[%s4765_s15 + $0x2c8] sm:$0xff] %v684_v25  ;;  %v686_v26 = vld [vmem:[%s4760_s14 + $0x5a0] sm:$0xff]  ;;  %v688_v27 = vld [vmem:[%s4760_s14 + $0x5b0] sm:$0xff] }
  0x42   : > { %v690_v28 = vld [vmem:[%s4760_s14 + $0x5c0] sm:$0xff]  ;;  %687 = vst [vmem:[%s4765_s15 + $0x2d0] sm:$0xff] %v686_v26  ;;  %689 = vst [vmem:[%s4765_s15 + $0x2d8] sm:$0xff] %v688_v27  ;;  %v692_v29 = vld [vmem:[%s4760_s14 + $0x5d0] sm:$0xff] }
  0x43   : > { %691 = vst [vmem:[%s4765_s15 + $0x2e0] sm:$0xff] %v690_v28  ;;  %v694_v30 = vld [vmem:[%s4760_s14 + $0x5e0] sm:$0xff]  ;;  %v696_v31 = vld [vmem:[%s4760_s14 + $0x5f0] sm:$0xff]  ;;  %693 = vst [vmem:[%s4765_s15 + $0x2e8] sm:$0xff] %v692_v29 }
  0x44   : > { %695 = vst [vmem:[%s4765_s15 + $0x2f0] sm:$0xff] %v694_v30  ;;  %697 = vst [vmem:[%s4765_s15 + $0x2f8] sm:$0xff] %v696_v31  ;;  %v698_v32 = vld [vmem:[%s4760_s14 + $0x600] sm:$0xff]  ;;  %v700_v33 = vld [vmem:[%s4760_s14 + $0x610] sm:$0xff] }
  0x45   : > { %v702_v34 = vld [vmem:[%s4760_s14 + $0x620] sm:$0xff]  ;;  %699 = vst [vmem:[%s4765_s15 + $0x300] sm:$0xff] %v698_v32  ;;  %701 = vst [vmem:[%s4765_s15 + $0x308] sm:$0xff] %v700_v33  ;;  %v704_v35 = vld [vmem:[%s4760_s14 + $0x630] sm:$0xff] }
  0x46   : > { %703 = vst [vmem:[%s4765_s15 + $0x310] sm:$0xff] %v702_v34  ;;  %v706_v36 = vld [vmem:[%s4760_s14 + $0x640] sm:$0xff]  ;;  %v708_v37 = vld [vmem:[%s4760_s14 + $0x650] sm:$0xff]  ;;  %705 = vst [vmem:[%s4765_s15 + $0x318] sm:$0xff] %v704_v35 }
  0x47   : > { %707 = vst [vmem:[%s4765_s15 + $0x320] sm:$0xff] %v706_v36  ;;  %709 = vst [vmem:[%s4765_s15 + $0x328] sm:$0xff] %v708_v37  ;;  %v710_v38 = vld [vmem:[%s4760_s14 + $0x660] sm:$0xff]  ;;  %v712_v39 = vld [vmem:[%s4760_s14 + $0x670] sm:$0xff] }
  0x48   : > { %v714_v40 = vld [vmem:[%s4760_s14 + $0x680] sm:$0xff]  ;;  %711 = vst [vmem:[%s4765_s15 + $0x330] sm:$0xff] %v710_v38  ;;  %713 = vst [vmem:[%s4765_s15 + $0x338] sm:$0xff] %v712_v39  ;;  %v716_v41 = vld [vmem:[%s4760_s14 + $0x690] sm:$0xff] }
  0x49   : > { %715 = vst [vmem:[%s4765_s15 + $0x340] sm:$0xff] %v714_v40  ;;  %v718_v42 = vld [vmem:[%s4760_s14 + $0x6a0] sm:$0xff]  ;;  %v720_v43 = vld [vmem:[%s4760_s14 + $0x6b0] sm:$0xff]  ;;  %717 = vst [vmem:[%s4765_s15 + $0x348] sm:$0xff] %v716_v41 }
  0x4a   : > { %719 = vst [vmem:[%s4765_s15 + $0x350] sm:$0xff] %v718_v42  ;;  %721 = vst [vmem:[%s4765_s15 + $0x358] sm:$0xff] %v720_v43  ;;  %v722_v44 = vld [vmem:[%s4760_s14 + $0x6c0] sm:$0xff]  ;;  %v724_v45 = vld [vmem:[%s4760_s14 + $0x6d0] sm:$0xff] }
  0x4b   : > { %v726_v46 = vld [vmem:[%s4760_s14 + $0x6e0] sm:$0xff]  ;;  %723 = vst [vmem:[%s4765_s15 + $0x360] sm:$0xff] %v722_v44  ;;  %725 = vst [vmem:[%s4765_s15 + $0x368] sm:$0xff] %v724_v45  ;;  %v728_v47 = vld [vmem:[%s4760_s14 + $0x6f0] sm:$0xff] }
  0x4c   : > { %727 = vst [vmem:[%s4765_s15 + $0x370] sm:$0xff] %v726_v46  ;;  %v730_v48 = vld [vmem:[%s4760_s14 + $0x700] sm:$0xff]  ;;  %v732_v49 = vld [vmem:[%s4760_s14 + $0x710] sm:$0xff]  ;;  %729 = vst [vmem:[%s4765_s15 + $0x378] sm:$0xff] %v728_v47 }
  0x4d   : > { %731 = vst [vmem:[%s4765_s15 + $0x380] sm:$0xff] %v730_v48  ;;  %733 = vst [vmem:[%s4765_s15 + $0x388] sm:$0xff] %v732_v49  ;;  %v734_v50 = vld [vmem:[%s4760_s14 + $0x720] sm:$0xff]  ;;  %v736_v51 = vld [vmem:[%s4760_s14 + $0x730] sm:$0xff] }
  0x4e   : > { %v738_v52 = vld [vmem:[%s4760_s14 + $0x740] sm:$0xff]  ;;  %735 = vst [vmem:[%s4765_s15 + $0x390] sm:$0xff] %v734_v50  ;;  %737 = vst [vmem:[%s4765_s15 + $0x398] sm:$0xff] %v736_v51  ;;  %v740_v53 = vld [vmem:[%s4760_s14 + $0x750] sm:$0xff] }
  0x4f   : > { %739 = vst [vmem:[%s4765_s15 + $0x3a0] sm:$0xff] %v738_v52  ;;  %v742_v54 = vld [vmem:[%s4760_s14 + $0x760] sm:$0xff]  ;;  %v744_v55 = vld [vmem:[%s4760_s14 + $0x770] sm:$0xff]  ;;  %741 = vst [vmem:[%s4765_s15 + $0x3a8] sm:$0xff] %v740_v53 }
  0x50   : > { %743 = vst [vmem:[%s4765_s15 + $0x3b0] sm:$0xff] %v742_v54  ;;  %745 = vst [vmem:[%s4765_s15 + $0x3b8] sm:$0xff] %v744_v55  ;;  %v746_v56 = vld [vmem:[%s4760_s14 + $0x780] sm:$0xff]  ;;  %v748_v57 = vld [vmem:[%s4760_s14 + $0x790] sm:$0xff] }
  0x51   : > { %v750_v58 = vld [vmem:[%s4760_s14 + $0x7a0] sm:$0xff]  ;;  %747 = vst [vmem:[%s4765_s15 + $0x3c0] sm:$0xff] %v746_v56  ;;  %749 = vst [vmem:[%s4765_s15 + $0x3c8] sm:$0xff] %v748_v57  ;;  %v752_v59 = vld [vmem:[%s4760_s14 + $0x7b0] sm:$0xff] }
  0x52   : > { %751 = vst [vmem:[%s4765_s15 + $0x3d0] sm:$0xff] %v750_v58  ;;  %v754_v60 = vld [vmem:[%s4760_s14 + $0x7c0] sm:$0xff]  ;;  %v756_v61 = vld [vmem:[%s4760_s14 + $0x7d0] sm:$0xff]  ;;  %753 = vst [vmem:[%s4765_s15 + $0x3d8] sm:$0xff] %v752_v59 }
  0x53   : > { %755 = vst [vmem:[%s4765_s15 + $0x3e0] sm:$0xff] %v754_v60  ;;  %757 = vst [vmem:[%s4765_s15 + $0x3e8] sm:$0xff] %v756_v61  ;;  %v758_v62 = vld [vmem:[%s4760_s14 + $0x7e0] sm:$0xff]  ;;  %v760_v63 = vld [vmem:[%s4760_s14 + $0x7f0] sm:$0xff] }
  0x54   : > { %759 = vst [vmem:[%s4765_s15 + $0x3f0] sm:$0xff] %v758_v62  ;;  %761 = vst [vmem:[%s4765_s15 + $0x3f8] sm:$0xff] %v760_v63 }
  0x55 PF: > { %p3808_p10 = scmp.ge.s32.totalorder %s4665_s24, 1  ;;  %p766_p11 = scmp.lt.s32.totalorder %s4665_s24, 3 }
  0x57   : > { %p767_p12 = pnand %p3808_p10, %p766_p11 }
  0x58   : > { %s5032_s28 = sand.u32 (!%p767_p12), 1, %s4657_s22   ;;  %p806_p13 = scmp.lt.s32.totalorder (!%p767_p12), %s4726_s25, 1 }
  0x59   : > { %770 = sbr.rel (%p767_p12) target bundleno = 1118 (0x45e), region = 78  ;;  %s3809_s10 = sshll.u32 (!%p767_p12), %s5032_s28, 10 }
  0x5a   : > { %s5052_s26 = scalar_lea.vmem (!%p767_p12), [#allocation2], %s3809_s10  ;;  %s3810_s17 = sshll.u32 (!%p767_p12), %s5032_s28, 3 }
  0x5b   : > { %s3944_s18 = sshll.u32 (!%p767_p12), %s4726_s25, 7  ;;  %s805_s19 = scalar_lea.vmem (!%p767_p12), [#allocation3], %s3810_s17 }
  0x5c   : > { %s3724_s9 = scalar_lea.hbm (!%p767_p12), %s6225_s6, %s3944_s18  ;;  %s4669_s12 = smov (!%p767_p12), [#allocation3]  }
  0x5d   : > { %s4609_s13 = sshll.u32 (!%p767_p12), %s4669_s12, 4  ;;  %s4610_s13 = int_to_ptr.vmem [resolvable:$false] %s4609_s13 }
  0x5e   : > { %v1027_v0 = vld [vmem:[%s6222_s3 + $0x18] sm:$0xff]  ;;  %v1026_v2 = vld [vmem:[%s6222_s3 + $0x10] sm:$0xff]  ;;  %v4667_v3 = vmov 0.0   ;;  %v1025_v5 = vld [vmem:[%s6222_s3 + $0x8] sm:$0xff]  ;;  %s807_s15 = scalar_select %p806_p13, %s4726_s25, 1  ;;  %vm822_vm0 = vcmask 261120  }
  0x5f   : > { %v814_v1 = vld [vmem:[%s6221_s2 + $0x18] sm:$0xff]  ;;  %4084 = vmatprep.subr.mxu0 %v4667_v3  ;;  %4295 = vmatprep.subr.mxu1 %v1027_v0  ;;  %v813_v4 = vld [vmem:[%s6221_s2 + $0x10] sm:$0xff]  ;;  %v812_v6 = vld [vmem:[%s6221_s2 + $0x8] sm:$0xff]  ;;  %vm4668_vm1 = vmmov 0   ;;  %vm2508_vm2 = vcmask 130048   ;;  %vm3535_vm3 = vcmask 1041409  }
  0x60   : > { %4085 = vmatpush3.msra.mxu0 %v814_v1  ;;  %4299 = vmatpush3.msra.mxu1 %v1027_v0  ;;  %v1024_v7 = vld [vmem:[%s6222_s3] sm:$0xff]  ;;  %s3811_s20 = sshll.u32 %s807_s15, 3  ;;  %v958_v9 = vld [vmem:[%s5052_s26 + $0x1f0] sm:$0xff]  ;;  %v959_v11 = vld [vmem:[%s5052_s26 + $0x1f8] sm:$0xff]  ;;  %vm3537_vm4 = vcmask 1042434   ;;  %vm3539_vm5 = vcmask 1043459  }
  0x61   : > { %4086 = vmatprep.subr.mxu0 %v4667_v3  ;;  %4296 = vmatprep.subr.mxu1 %v1026_v2  ;;  %v811_v8 = vld [vmem:[%s6221_s2] sm:$0xff]  ;;  %s809_s11 = scalar_lea.vmem %s6219_s0, %s3811_s20  ;;  %v961_v14 = vld [vmem:[%s5052_s26 + $0x208] sm:$0xff]  ;;  %v962_v15 = vld [vmem:[%s5052_s26 + $0x210] sm:$0xff]  ;;  %vm3541_vm6 = vcmask 1044484   ;;  %vm3543_vm7 = vcmask 1045509   ;;  %vm3545_vm8 = vcmask 1046534  }
  0x62   : > { %4087 = vmatpush3.msra.mxu0 %v813_v4  ;;  %4300 = vmatpush3.msra.mxu1 %v1026_v2  ;;  %v810_v10 = vld [vmem:[%s809_s11] sm:$0xff]  ;;  %v897_v16 = vld [vmem:[%s5052_s26 + $0x8] sm:$0xff]  ;;  %v963_v17 = vld [vmem:[%s5052_s26 + $0x218] sm:$0xff]  ;;  %vm3547_vm9 = vcmask 1047559   ;;  %s3726_s20 = sshll.u32 %s805_s19, 4  ;;  %s3713_s11 = scalar_lea.sflag [#allocation4], %s5032_s28  ;;  %s3727_s20 = int_to_ptr.vmem [resolvable:$true] %s3726_s20 }
  0x63   : > { %4088 = vmatprep.subr.mxu0 %v4667_v3  ;;  %4297 = vmatprep.subr.mxu1 %v1025_v5  ;;  %v960_v12 = vld [vmem:[%s5052_s26 + $0x200] sm:$0xff]  ;;  %v898_v18 = vld [vmem:[%s5052_s26 + $0x10] sm:$0xff]  ;;  %v899_v20 = vld [vmem:[%s5052_s26 + $0x18] sm:$0xff]  ;;  %s4605_s10 = scalar_lea.vmem %s3727_s20, 128  ;;  %s4611_s25 = scalar_lea.vmem %s4610_s13, 256 }
  0x64   : > { %4089 = vmatpush3.msra.mxu0 %v812_v6  ;;  %4301 = vmatpush3.msra.mxu1 %v1025_v5  ;;  %v896_v13 = vld [vmem:[%s5052_s26] sm:$0xff]  ;;  %v965_v21 = vld [vmem:[%s5052_s26 + $0x228] sm:$0xff]  ;;  %v966_v23 = vld [vmem:[%s5052_s26 + $0x230] sm:$0xff]  ;;  %p4606_p0 = scmp.ne.s32.totalorder %s3727_s20, %s4605_s10  ;;  %p4612_p3 = scmp.lt.s32.totalorder %s3727_s20, %s4610_s13 }
  0x65   : > { %4090 = vmatprep.subr.mxu0 %v4667_v3  ;;  %4298 = vmatprep.subr.mxu1 %v1024_v7  ;;  %v964_v19 = vld [vmem:[%s5052_s26 + $0x220] sm:$0xff]  ;;  %v901_v24 = vld [vmem:[%s5052_s26 + $0x28] sm:$0xff]  ;;  %v967_v25 = vld [vmem:[%s5052_s26 + $0x238] sm:$0xff]  ;;  %p4613_p4 = scmp.lt.s32.totalorder %s4611_s25, %s4605_s10 }
  0x66   : > { %4091 = vmatpush3.msra.mxu0 %v811_v8  ;;  %4092 = vmatprep.mubr.msk.f32.mxu0 %vm4668_vm1, %v4667_v3  ;;  %v900_v22 = vld [vmem:[%s5052_s26 + $0x20] sm:$0xff]  ;;  %v902_v26 = vld [vmem:[%s5052_s26 + $0x30] sm:$0xff]  ;;  %v903_v28 = vld [vmem:[%s5052_s26 + $0x38] sm:$0xff]  ;;  %p4607_p1 = pnand %p4606_p0, %p4744_p6 }
  0x67   : > { %4302 = vmatpush3.msra.mxu1 %v1024_v7  ;;  %4196 = vmatprep.mubr.msk.f32.mxu1 %vm822_vm0, %v958_v9  ;;  %v968_v27 = vld [vmem:[%s5052_s26 + $0x240] sm:$0xff]  ;;  %v969_v29 = vld [vmem:[%s5052_s26 + $0x248] sm:$0xff]  ;;  %v970_v31 = vld [vmem:[%s5052_s26 + $0x250] sm:$0xff]  ;;  %p4614_p5 = por %p4613_p4, %p4612_p3 }
  0x68   : > { %4093 = vmatmul.mubr.msk.f32.vlgmr.msra.gmra.mxu0 %vm822_vm0, %v810_v10  ;;  %4095 = vmatprep.subr.mxu0 %v1027_v0  ;;  %v904_v30 = vld [vmem:[%s5052_s26 + $0x40] sm:$0xff]  ;;  %v905_v32 = vld [vmem:[%s5052_s26 + $0x48] sm:$0xff]  ;;  %v971_v33 = vld [vmem:[%s5052_s26 + $0x258] sm:$0xff]  ;;  %p4608_p2 = pneg %p4607_p1 }
  0x69   : > { %4197 = vmatmul.mubr.msk.f32.vlgmr.msra.gmra.mxu1 %vm822_vm0, %v959_v11  ;;  %4096 = vmatpush3.msra.mxu0 %v1027_v0  ;;  %v906_v34 = vld [vmem:[%s5052_s26 + $0x50] sm:$0xff]  ;;  %v972_v35 = vld [vmem:[%s5052_s26 + $0x260] sm:$0xff]  ;;  %v907_v36 = vld [vmem:[%s5052_s26 + $0x58] sm:$0xff] }
  0x6a   : > { %4097 = vmatprep.subr.mxu0 %v1026_v2  ;;  %4199 = vmatprep.mubr.msk.f32.mxu1 %vm822_vm0, %v960_v12  ;;  %v973_v37 = vld [vmem:[%s5052_s26 + $0x268] sm:$0xff]  ;;  %v908_v38 = vld [vmem:[%s5052_s26 + $0x60] sm:$0xff]  ;;  %v974_v39 = vld [vmem:[%s5052_s26 + $0x270] sm:$0xff]  ;;  %p4615_p7 = pnand %p4614_p5, %p4608_p2 }
  0x6b   : > { %4098 = vmatpush3.msra.mxu0 %v1026_v2  ;;  %4103 = vmatprep.mubr.msk.f32.mxu0 %vm822_vm0, %v896_v13  ;;  %v909_v40 = vld [vmem:[%s5052_s26 + $0x68] sm:$0xff]  ;;  %v975_v41 = vld [vmem:[%s5052_s26 + $0x278] sm:$0xff]  ;;  %v910_v42 = vld [vmem:[%s5052_s26 + $0x70] sm:$0xff] }
  0x6c   : > { %4099 = vmatprep.subr.mxu0 %v1025_v5  ;;  %v976_v43 = vld [vmem:[%s5052_s26 + $0x280] sm:$0xff]  ;;  %v911_v44 = vld [vmem:[%s5052_s26 + $0x78] sm:$0xff]  ;;  %v977_v45 = vld [vmem:[%s5052_s26 + $0x288] sm:$0xff] }
  0x6d   : > { %4200 = vmatmul.mubr.msk.f32.gmra.mxu1 %vm822_vm0, %v961_v14  ;;  %4100 = vmatpush3.msra.mxu0 %v1025_v5  ;;  %v912_v46 = vld [vmem:[%s5052_s26 + $0x80] sm:$0xff]  ;;  %v978_v47 = vld [vmem:[%s5052_s26 + $0x290] sm:$0xff]  ;;  %v913_v48 = vld [vmem:[%s5052_s26 + $0x88] sm:$0xff] }
  0x6e   : > { %4101 = vmatprep.subr.mxu0 %v1024_v7  ;;  %4202 = vmatprep.mubr.msk.f32.mxu1 %vm822_vm0, %v962_v15  ;;  %v979_v49 = vld [vmem:[%s5052_s26 + $0x298] sm:$0xff]  ;;  %v914_v50 = vld [vmem:[%s5052_s26 + $0x90] sm:$0xff]  ;;  %v980_v51 = vld [vmem:[%s5052_s26 + $0x2a0] sm:$0xff] }
  0x6f   : > { %4102 = vmatpush3.msra.mxu0 %v1024_v7  ;;  %v915_v52 = vld [vmem:[%s5052_s26 + $0x98] sm:$0xff]  ;;  %v981_v53 = vld [vmem:[%s5052_s26 + $0x2a8] sm:$0xff]  ;;  %v916_v54 = vld [vmem:[%s5052_s26 + $0xa0] sm:$0xff] }
  0x70   : > { %4104 = vmatmul.mubr.msk.f32.vlgmr.msra.gmra.mxu0 %vm822_vm0, %v897_v16  ;;  %v982_v55 = vld [vmem:[%s5052_s26 + $0x2b0] sm:$0xff]  ;;  %v917_v56 = vld [vmem:[%s5052_s26 + $0xa8] sm:$0xff]  ;;  %v983_v57 = vld [vmem:[%s5052_s26 + $0x2b8] sm:$0xff] }
  0x71   : > { %4203 = vmatmul.mubr.msk.f32.gmra.mxu1 %vm822_vm0, %v963_v17  ;;  %4106 = vmatprep.mubr.msk.f32.mxu0 %vm822_vm0, %v898_v18  ;;  %v918_v58 = vld [vmem:[%s5052_s26 + $0xb0] sm:$0xff]  ;;  %v984_v59 = vld [vmem:[%s5052_s26 + $0x2c0] sm:$0xff]  ;;  %v919_v60 = vld [vmem:[%s5052_s26 + $0xb8] sm:$0xff] }
  0x72   : > { %4205 = vmatprep.mubr.msk.f32.mxu1 %vm822_vm0, %v964_v19  ;;  %v985_v61 = vld [vmem:[%s5052_s26 + $0x2c8] sm:$0xff]  ;;  %v920_v62 = vld [vmem:[%s5052_s26 + $0xc0] sm:$0xff]  ;;  %v986_v63 = vld [vmem:[%s5052_s26 + $0x2d0] sm:$0xff] }
  0x73   : > { %v921_v0 = vld [vmem:[%s5052_s26 + $0xc8] sm:$0xff]  ;;  %v987_v1 = vld [vmem:[%s5052_s26 + $0x2d8] sm:$0xff]  ;;  %v922_v2 = vld [vmem:[%s5052_s26 + $0xd0] sm:$0xff] }
  0x74   : > { %4107 = vmatmul.mubr.msk.f32.gmra.mxu0 %vm822_vm0, %v899_v20  ;;  %v988_v3 = vld [vmem:[%s5052_s26 + $0x2e0] sm:$0xff]  ;;  %v923_v4 = vld [vmem:[%s5052_s26 + $0xd8] sm:$0xff]  ;;  %v989_v5 = vld [vmem:[%s5052_s26 + $0x2e8] sm:$0xff] }
  0x75   : > { %4206 = vmatmul.mubr.msk.f32.gmra.mxu1 %vm822_vm0, %v965_v21  ;;  %4109 = vmatprep.mubr.msk.f32.mxu0 %vm822_vm0, %v900_v22  ;;  %v924_v6 = vld [vmem:[%s5052_s26 + $0xe0] sm:$0xff]  ;;  %v990_v7 = vld [vmem:[%s5052_s26 + $0x2f0] sm:$0xff]  ;;  %v925_v8 = vld [vmem:[%s5052_s26 + $0xe8] sm:$0xff] }
  0x76   : > { %4208 = vmatprep.mubr.msk.f32.mxu1 %vm822_vm0, %v966_v23  ;;  %v991_v9 = vld [vmem:[%s5052_s26 + $0x2f8] sm:$0xff]  ;;  %v926_v10 = vld [vmem:[%s5052_s26 + $0xf0] sm:$0xff]  ;;  %v992_v11 = vld [vmem:[%s5052_s26 + $0x300] sm:$0xff] }
  0x77   : > { %v927_v12 = vld [vmem:[%s5052_s26 + $0xf8] sm:$0xff]  ;;  %v993_v13 = vld [vmem:[%s5052_s26 + $0x308] sm:$0xff]  ;;  %v928_v14 = vld [vmem:[%s5052_s26 + $0x100] sm:$0xff] }
  0x78   : > { %4110 = vmatmul.mubr.msk.f32.gmra.mxu0 %vm822_vm0, %v901_v24  ;;  %v994_v15 = vld [vmem:[%s5052_s26 + $0x310] sm:$0xff]  ;;  %v929_v16 = vld [vmem:[%s5052_s26 + $0x108] sm:$0xff]  ;;  %v995_v17 = vld [vmem:[%s5052_s26 + $0x318] sm:$0xff] }
  0x79   : > { %4209 = vmatmul.mubr.msk.f32.gmra.mxu1 %vm822_vm0, %v967_v25  ;;  %4112 = vmatprep.mubr.msk.f32.mxu0 %vm822_vm0, %v902_v26  ;;  %v930_v18 = vld [vmem:[%s5052_s26 + $0x110] sm:$0xff]  ;;  %v996_v19 = vld [vmem:[%s5052_s26 + $0x320] sm:$0xff]  ;;  %v931_v20 = vld [vmem:[%s5052_s26 + $0x118] sm:$0xff] }
  0x7a   : > { %4211 = vmatprep.mubr.msk.f32.mxu1 %vm822_vm0, %v968_v27  ;;  %v997_v21 = vld [vmem:[%s5052_s26 + $0x328] sm:$0xff]  ;;  %v932_v22 = vld [vmem:[%s5052_s26 + $0x120] sm:$0xff]  ;;  %v998_v23 = vld [vmem:[%s5052_s26 + $0x330] sm:$0xff] }
  0x7b   : > { %v933_v24 = vld [vmem:[%s5052_s26 + $0x128] sm:$0xff]  ;;  %v999_v25 = vld [vmem:[%s5052_s26 + $0x338] sm:$0xff]  ;;  %v934_v26 = vld [vmem:[%s5052_s26 + $0x130] sm:$0xff] }
  0x7c   : > { %4113 = vmatmul.mubr.msk.f32.gmra.mxu0 %vm822_vm0, %v903_v28  ;;  %v1000_v27 = vld [vmem:[%s5052_s26 + $0x340] sm:$0xff]  ;;  %v935_v28 = vld [vmem:[%s5052_s26 + $0x138] sm:$0xff] }
  0x7d   : > { %4212 = vmatmul.mubr.msk.f32.gmra.mxu1 %vm822_vm0, %v969_v29  ;;  %4115 = vmatprep.mubr.msk.f32.mxu0 %vm822_vm0, %v904_v30  ;;  %v1001_v29 = vld [vmem:[%s5052_s26 + $0x348] sm:$0xff]  ;;  %v936_v30 = vld [vmem:[%s5052_s26 + $0x140] sm:$0xff] }
  0x7e   : > { %4214 = vmatprep.mubr.msk.f32.mxu1 %vm822_vm0, %v970_v31  ;;  %v1002_v31 = vld [vmem:[%s5052_s26 + $0x350] sm:$0xff] }
  0x80   : > { %4116 = vmatmul.mubr.msk.f32.gmra.mxu0 %vm822_vm0, %v905_v32  ;;  %v937_v32 = vld [vmem:[%s5052_s26 + $0x148] sm:$0xff] }
  0x81   : > { %4215 = vmatmul.mubr.msk.f32.gmra.mxu1 %vm822_vm0, %v971_v33  ;;  %4118 = vmatprep.mubr.msk.f32.mxu0 %vm822_vm0, %v906_v34  ;;  %v1003_v33 = vld [vmem:[%s5052_s26 + $0x358] sm:$0xff]  ;;  %v938_v34 = vld [vmem:[%s5052_s26 + $0x150] sm:$0xff] }
  0x82   : > { %4217 = vmatprep.mubr.msk.f32.mxu1 %vm822_vm0, %v972_v35  ;;  %v1004_v35 = vld [vmem:[%s5052_s26 + $0x360] sm:$0xff] }
  0x84   : > { %4119 = vmatmul.mubr.msk.f32.gmra.mxu0 %vm822_vm0, %v907_v36  ;;  %v939_v36 = vld [vmem:[%s5052_s26 + $0x158] sm:$0xff] }
  0x85   : > { %4218 = vmatmul.mubr.msk.f32.gmra.mxu1 %vm822_vm0, %v973_v37  ;;  %4121 = vmatprep.mubr.msk.f32.mxu0 %vm822_vm0, %v908_v38  ;;  %v1005_v37 = vld [vmem:[%s5052_s26 + $0x368] sm:$0xff]  ;;  %v940_v38 = vld [vmem:[%s5052_s26 + $0x160] sm:$0xff] }
  0x86   : > { %4220 = vmatprep.mubr.msk.f32.mxu1 %vm822_vm0, %v974_v39  ;;  %v1006_v39 = vld [vmem:[%s5052_s26 + $0x370] sm:$0xff] }
  0x88   : > { %4122 = vmatmul.mubr.msk.f32.gmra.mxu0 %vm822_vm0, %v909_v40  ;;  %v941_v40 = vld [vmem:[%s5052_s26 + $0x168] sm:$0xff] }
  0x89   : > { %4221 = vmatmul.mubr.msk.f32.gmra.mxu1 %vm822_vm0, %v975_v41  ;;  %4124 = vmatprep.mubr.msk.f32.mxu0 %vm822_vm0, %v910_v42  ;;  %v1007_v41 = vld [vmem:[%s5052_s26 + $0x378] sm:$0xff]  ;;  %v942_v42 = vld [vmem:[%s5052_s26 + $0x170] sm:$0xff] }
  0x8a   : > { %4223 = vmatprep.mubr.msk.f32.mxu1 %vm822_vm0, %v976_v43  ;;  %v1008_v43 = vld [vmem:[%s5052_s26 + $0x380] sm:$0xff] }
  0x8c   : > { %4125 = vmatmul.mubr.msk.f32.gmra.mxu0 %vm822_vm0, %v911_v44  ;;  %v943_v44 = vld [vmem:[%s5052_s26 + $0x178] sm:$0xff] }
  0x8d   : > { %4224 = vmatmul.mubr.msk.f32.gmra.mxu1 %vm822_vm0, %v977_v45  ;;  %4127 = vmatprep.mubr.msk.f32.mxu0 %vm822_vm0, %v912_v46  ;;  %v1009_v45 = vld [vmem:[%s5052_s26 + $0x388] sm:$0xff]  ;;  %v944_v46 = vld [vmem:[%s5052_s26 + $0x180] sm:$0xff] }
  0x8e   : > { %4226 = vmatprep.mubr.msk.f32.mxu1 %vm822_vm0, %v978_v47  ;;  %v1010_v47 = vld [vmem:[%s5052_s26 + $0x390] sm:$0xff] }
  0x90   : > { %4128 = vmatmul.mubr.msk.f32.gmra.mxu0 %vm822_vm0, %v913_v48  ;;  %v945_v48 = vld [vmem:[%s5052_s26 + $0x188] sm:$0xff] }
  0x91   : > { %4227 = vmatmul.mubr.msk.f32.gmra.mxu1 %vm822_vm0, %v979_v49  ;;  %4130 = vmatprep.mubr.msk.f32.mxu0 %vm822_vm0, %v914_v50  ;;  %v1011_v49 = vld [vmem:[%s5052_s26 + $0x398] sm:$0xff]  ;;  %v946_v50 = vld [vmem:[%s5052_s26 + $0x190] sm:$0xff] }
  0x92   : > { %4229 = vmatprep.mubr.msk.f32.mxu1 %vm822_vm0, %v980_v51  ;;  %v1012_v51 = vld [vmem:[%s5052_s26 + $0x3a0] sm:$0xff] }
  0x94   : > { %4131 = vmatmul.mubr.msk.f32.gmra.mxu0 %vm822_vm0, %v915_v52  ;;  %v947_v52 = vld [vmem:[%s5052_s26 + $0x198] sm:$0xff] }
  0x95   : > { %4230 = vmatmul.mubr.msk.f32.gmra.mxu1 %vm822_vm0, %v981_v53  ;;  %4133 = vmatprep.mubr.msk.f32.mxu0 %vm822_vm0, %v916_v54  ;;  %v1013_v53 = vld [vmem:[%s5052_s26 + $0x3a8] sm:$0xff]  ;;  %v948_v54 = vld [vmem:[%s5052_s26 + $0x1a0] sm:$0xff] }
  0x96   : > { %4232 = vmatprep.mubr.msk.f32.mxu1 %vm822_vm0, %v982_v55  ;;  %v1014_v55 = vld [vmem:[%s5052_s26 + $0x3b0] sm:$0xff] }
  0x98   : > { %4134 = vmatmul.mubr.msk.f32.gmra.mxu0 %vm822_vm0, %v917_v56  ;;  %v949_v56 = vld [vmem:[%s5052_s26 + $0x1a8] sm:$0xff] }
  0x99   : > { %4233 = vmatmul.mubr.msk.f32.gmra.mxu1 %vm822_vm0, %v983_v57  ;;  %4136 = vmatprep.mubr.msk.f32.mxu0 %vm822_vm0, %v918_v58  ;;  %v1015_v57 = vld [vmem:[%s5052_s26 + $0x3b8] sm:$0xff]  ;;  %v950_v58 = vld [vmem:[%s5052_s26 + $0x1b0] sm:$0xff] }
  0x9a   : > { %4235 = vmatprep.mubr.msk.f32.mxu1 %vm822_vm0, %v984_v59  ;;  %v1016_v59 = vld [vmem:[%s5052_s26 + $0x3c0] sm:$0xff] }
  0x9c   : > { %4137 = vmatmul.mubr.msk.f32.gmra.mxu0 %vm822_vm0, %v919_v60  ;;  %v951_v60 = vld [vmem:[%s5052_s26 + $0x1b8] sm:$0xff] }
  0x9d   : > { %4236 = vmatmul.mubr.msk.f32.gmra.mxu1 %vm822_vm0, %v985_v61  ;;  %4139 = vmatprep.mubr.msk.f32.mxu0 %vm822_vm0, %v920_v62  ;;  %v1017_v61 = vld [vmem:[%s5052_s26 + $0x3c8] sm:$0xff]  ;;  %v952_v62 = vld [vmem:[%s5052_s26 + $0x1c0] sm:$0xff] }
  0x9e   : > { %4238 = vmatprep.mubr.msk.f32.mxu1 %vm822_vm0, %v986_v63  ;;  %v1018_v63 = vld [vmem:[%s5052_s26 + $0x3d0] sm:$0xff] }
  0xa0   : > { %4140 = vmatmul.mubr.msk.f32.gmra.mxu0 %vm822_vm0, %v921_v0  ;;  %v953_v0 = vld [vmem:[%s5052_s26 + $0x1c8] sm:$0xff] }
  0xa1   : > { %4239 = vmatmul.mubr.msk.f32.gmra.mxu1 %vm822_vm0, %v987_v1  ;;  %4142 = vmatprep.mubr.msk.f32.mxu0 %vm822_vm0, %v922_v2  ;;  %v1019_v1 = vld [vmem:[%s5052_s26 + $0x3d8] sm:$0xff]  ;;  %v954_v2 = vld [vmem:[%s5052_s26 + $0x1d0] sm:$0xff] }
  0xa2   : > { %4241 = vmatprep.mubr.msk.f32.mxu1 %vm822_vm0, %v988_v3  ;;  %v1020_v3 = vld [vmem:[%s5052_s26 + $0x3e0] sm:$0xff] }
  0xa4   : > { %4143 = vmatmul.mubr.msk.f32.gmra.mxu0 %vm822_vm0, %v923_v4  ;;  %v955_v4 = vld [vmem:[%s5052_s26 + $0x1d8] sm:$0xff] }
  0xa5   : > { %4242 = vmatmul.mubr.msk.f32.gmra.mxu1 %vm822_vm0, %v989_v5  ;;  %4145 = vmatprep.mubr.msk.f32.mxu0 %vm822_vm0, %v924_v6  ;;  %v1021_v5 = vld [vmem:[%s5052_s26 + $0x3e8] sm:$0xff]  ;;  %v956_v6 = vld [vmem:[%s5052_s26 + $0x1e0] sm:$0xff] }
  0xa6   : > { %4244 = vmatprep.mubr.msk.f32.mxu1 %vm822_vm0, %v990_v7  ;;  %v1022_v7 = vld [vmem:[%s5052_s26 + $0x3f0] sm:$0xff] }
  0xa8   : > { %4146 = vmatmul.mubr.msk.f32.gmra.mxu0 %vm822_vm0, %v925_v8  ;;  %v957_v8 = vld [vmem:[%s5052_s26 + $0x1e8] sm:$0xff] }
  0xa9   : > { %4245 = vmatmul.mubr.msk.f32.gmra.mxu1 %vm822_vm0, %v991_v9  ;;  %4148 = vmatprep.mubr.msk.f32.mxu0 %vm822_vm0, %v926_v10  ;;  %v1023_v9 = vld [vmem:[%s5052_s26 + $0x3f8] sm:$0xff]  ;;  %v3812_v10 = vld [vmem:[%s6223_s4] ss:$0 sm:$0xff] }
  0xaa   : > { %4247 = vmatprep.mubr.msk.f32.mxu1 %vm822_vm0, %v992_v11 }
  0xac   : > { %4149 = vmatmul.mubr.msk.f32.gmra.mxu0 %vm822_vm0, %v927_v12 }
  0xad   : > { %4248 = vmatmul.mubr.msk.f32.gmra.mxu1 %vm822_vm0, %v993_v13  ;;  %4151 = vmatprep.mubr.msk.f32.mxu0 %vm822_vm0, %v928_v14 }
  0xae   : > { %4250 = vmatprep.mubr.msk.f32.mxu1 %vm822_vm0, %v994_v15 }
  0xb0   : > { %4152 = vmatmul.mubr.msk.f32.gmra.mxu0 %vm822_vm0, %v929_v16 }
  0xb1   : > { %4251 = vmatmul.mubr.msk.f32.gmra.mxu1 %vm822_vm0, %v995_v17  ;;  %4154 = vmatprep.mubr.msk.f32.mxu0 %vm822_vm0, %v930_v18 }
  0xb2   : > { %4253 = vmatprep.mubr.msk.f32.mxu1 %vm822_vm0, %v996_v19 }
  0xb4   : > { %4155 = vmatmul.mubr.msk.f32.gmra.mxu0 %vm822_vm0, %v931_v20 }
  0xb5   : > { %4254 = vmatmul.mubr.msk.f32.gmra.mxu1 %vm822_vm0, %v997_v21  ;;  %4157 = vmatprep.mubr.msk.f32.mxu0 %vm822_vm0, %v932_v22 }
  0xb6   : > { %4256 = vmatprep.mubr.msk.f32.mxu1 %vm822_vm0, %v998_v23 }
  0xb8   : > { %4158 = vmatmul.mubr.msk.f32.gmra.mxu0 %vm822_vm0, %v933_v24 }
  0xb9   : > { %4257 = vmatmul.mubr.msk.f32.gmra.mxu1 %vm822_vm0, %v999_v25  ;;  %4160 = vmatprep.mubr.msk.f32.mxu0 %vm822_vm0, %v934_v26 }
  0xba   : > { %4259 = vmatprep.mubr.msk.f32.mxu1 %vm822_vm0, %v1000_v27 }
  0xbc   : > { %4161 = vmatmul.mubr.msk.f32.gmra.mxu0 %vm822_vm0, %v935_v28 }
  0xbd   : > { %4260 = vmatmul.mubr.msk.f32.gmra.mxu1 %vm822_vm0, %v1001_v29  ;;  %4163 = vmatprep.mubr.msk.f32.mxu0 %vm822_vm0, %v936_v30 }
  0xbe   : > { %4262 = vmatprep.mubr.msk.f32.mxu1 %vm822_vm0, %v1002_v31 }
  0xc0   : > { %4164 = vmatmul.mubr.msk.f32.gmra.mxu0 %vm822_vm0, %v937_v32 }
  0xc1   : > { %4263 = vmatmul.mubr.msk.f32.gmra.mxu1 %vm822_vm0, %v1003_v33  ;;  %4166 = vmatprep.mubr.msk.f32.mxu0 %vm822_vm0, %v938_v34 }
  0xc2   : > { %4265 = vmatprep.mubr.msk.f32.mxu1 %vm822_vm0, %v1004_v35 }
  0xc4   : > { %4167 = vmatmul.mubr.msk.f32.gmra.mxu0 %vm822_vm0, %v939_v36 }
  0xc5   : > { %4266 = vmatmul.mubr.msk.f32.gmra.mxu1 %vm822_vm0, %v1005_v37  ;;  %4169 = vmatprep.mubr.msk.f32.mxu0 %vm822_vm0, %v940_v38  ;;  %v5332_v37 = vld [vmem:[%s6224_s5] ss:$0 sm:$0xff] }
  0xc6   : > { %4268 = vmatprep.mubr.msk.f32.mxu1 %vm822_vm0, %v1006_v39 }
  0xc8   : > { %4170 = vmatmul.mubr.msk.f32.gmra.mxu0 %vm822_vm0, %v941_v40 }
  0xc9   : > { %4269 = vmatmul.mubr.msk.f32.gmra.mxu1 %vm822_vm0, %v1007_v41  ;;  %4172 = vmatprep.mubr.msk.f32.mxu0 %vm822_vm0, %v942_v42 }
  0xca   : > { %4271 = vmatprep.mubr.msk.f32.mxu1 %vm822_vm0, %v1008_v43 }
  0xcc   : > { %4173 = vmatmul.mubr.msk.f32.gmra.mxu0 %vm822_vm0, %v943_v44 }
  0xcd   : > { %4272 = vmatmul.mubr.msk.f32.gmra.mxu1 %vm822_vm0, %v1009_v45  ;;  %4175 = vmatprep.mubr.msk.f32.mxu0 %vm822_vm0, %v944_v46 }
  0xce   : > { %4274 = vmatprep.mubr.msk.f32.mxu1 %vm822_vm0, %v1010_v47 }
  0xd0   : > { %4176 = vmatmul.mubr.msk.f32.gmra.mxu0 %vm822_vm0, %v945_v48 }
  0xd1   : > { %4275 = vmatmul.mubr.msk.f32.gmra.mxu1 %vm822_vm0, %v1011_v49  ;;  %4178 = vmatprep.mubr.msk.f32.mxu0 %vm822_vm0, %v946_v50 }
  0xd2   : > { %4277 = vmatprep.mubr.msk.f32.mxu1 %vm822_vm0, %v1012_v51 }
  0xd4   : > { %4179 = vmatmul.mubr.msk.f32.gmra.mxu0 %vm822_vm0, %v947_v52 }
  0xd5   : > { %4278 = vmatmul.mubr.msk.f32.gmra.mxu1 %vm822_vm0, %v1013_v53  ;;  %4181 = vmatprep.mubr.msk.f32.mxu0 %vm822_vm0, %v948_v54 }
  0xd6   : > { %4280 = vmatprep.mubr.msk.f32.mxu1 %vm822_vm0, %v1014_v55 }
  0xd8   : > { %4182 = vmatmul.mubr.msk.f32.gmra.mxu0 %vm822_vm0, %v949_v56 }
  0xd9   : > { %4281 = vmatmul.mubr.msk.f32.gmra.mxu1 %vm822_vm0, %v1015_v57  ;;  %4184 = vmatprep.mubr.msk.f32.mxu0 %vm822_vm0, %v950_v58 }
  0xda   : > { %4283 = vmatprep.mubr.msk.f32.mxu1 %vm822_vm0, %v1016_v59 }
  0xdc   : > { %4185 = vmatmul.mubr.msk.f32.gmra.mxu0 %vm822_vm0, %v951_v60 }
  0xdd   : > { %4284 = vmatmul.mubr.msk.f32.gmra.mxu1 %vm822_vm0, %v1017_v61  ;;  %4187 = vmatprep.mubr.msk.f32.mxu0 %vm822_vm0, %v952_v62 }
  0xde   : > { %4286 = vmatprep.mubr.msk.f32.mxu1 %vm822_vm0, %v1018_v63 }
  0xe0   : > { %4188 = vmatmul.mubr.msk.f32.gmra.mxu0 %vm822_vm0, %v953_v0 }
  0xe1   : > { %4287 = vmatmul.mubr.msk.f32.gmra.mxu1 %vm822_vm0, %v1019_v1  ;;  %4190 = vmatprep.mubr.msk.f32.mxu0 %vm822_vm0, %v954_v2 }
  0xe2   : > { %4289 = vmatprep.mubr.msk.f32.mxu1 %vm822_vm0, %v1020_v3 }
  0xe4   : > { %4191 = vmatmul.mubr.msk.f32.gmra.mxu0 %vm822_vm0, %v955_v4 }
  0xe5   : > { %4290 = vmatmul.mubr.msk.f32.gmra.mxu1 %vm822_vm0, %v1021_v5  ;;  %4193 = vmatprep.mubr.msk.f32.mxu0 %vm822_vm0, %v956_v6 }
  0xe6   : > { %4292 = vmatprep.mubr.msk.f32.mxu1 %vm822_vm0, %v1022_v7 }
  0xe8   : > { %4194 = vmatmul.mubr.msk.f32.gmra.mxu0 %vm822_vm0, %v957_v8 }
  0xe9   : > { %4293 = vmatmul.mubr.msk.f32.gmra.mxu1 %vm822_vm0, %v1023_v9 }
 0x128   : > { %v892_v11 = vpop.f32.mrf.mxu0 }
 0x129   : > { %v5317_v12 = vadd.f32 %v3812_v10, %v892_v11  ;;  %v4198_v13 = vpop.f32.mrf.mxu1 }
 0x12a   : > { %v4094_v14 = vpop.f32.mrf.mxu0 }
 0x12b   : > { %v2180_v15 = vadd.f32 %v4198_v13, %v5317_v12  ;;  %v1788_v16 = vpop.f32.mrf.mxu1 }
 0x12c   : > { %v2179_v17 = vadd.f32 %v1788_v16, %v5317_v12 }
 0x12d   : > { %4344 = vtanh.f32 %v2180_v15  ;;  %v4201_v18 = vpop.f32.mrf.mxu1 }
 0x12e   : > { %4346 = vtanh.f32 %v2179_v17  ;;  %v2182_v19 = vadd.f32 %v4201_v18, %v5317_v12 }
 0x12f   : > { %v1798_v20 = vpop.f32.mrf.mxu1 }
 0x130   : > { %4348 = vtanh.f32 %v2182_v19  ;;  %v2181_v21 = vadd.f32 %v1798_v20, %v5317_v12  ;;  %v4105_v22 = vpop.f32.mrf.mxu0 }
 0x131   : > { %v2118_v23 = vadd.f32 %v4105_v22, %v5317_v12  ;;  %v4204_v24 = vpop.f32.mrf.mxu1 }
 0x132   : > { %4350 = vtanh.f32 %v2181_v21  ;;  %v2184_v25 = vadd.f32 %v4204_v24, %v5317_v12  ;;  %v1478_v26 = vpop.f32.mrf.mxu0 }
 0x133   : > { %4352 = vtanh.f32 %v2118_v23  ;;  %v2117_v27 = vadd.f32 %v1478_v26, %v5317_v12  ;;  %v1808_v28 = vpop.f32.mrf.mxu1 }
 0x134   : > { %4354 = vtanh.f32 %v2184_v25  ;;  %v4108_v29 = vpop.f32.mrf.mxu0  ;;  %v2183_v32 = vadd.f32 %v1808_v28, %v5317_v12 }
 0x135   : > { %v2120_v30 = vadd.f32 %v4108_v29, %v5317_v12  ;;  %v4207_v31 = vpop.f32.mrf.mxu1  ;;  %4356 = vtanh.f32 %v2117_v27 }
 0x136   : > { %v1488_v33 = vpop.f32.mrf.mxu0  ;;  %v2186_v41 = vadd.f32 %v4207_v31, %v5317_v12 }
 0x137   : > { %4358 = vtanh.f32 %v2120_v30  ;;  %v2119_v34 = vadd.f32 %v1488_v33, %v5317_v12  ;;  %v1818_v35 = vpop.f32.mrf.mxu1 }
 0x138   : > { %v4111_v36 = vpop.f32.mrf.mxu0  ;;  %v2185_v38 = vadd.f32 %v1818_v35, %v5317_v12 }
 0x139   : > { %4360 = vtanh.f32 %v2119_v34  ;;  %v4210_v39 = vpop.f32.mrf.mxu1  ;;  %v2122_v49 = vadd.f32 %v4111_v36, %v5317_v12 }
 0x13a   : > { %v4345_v40 = vpop.eup %4344  ;;  %4362 = vtanh.f32 %v2183_v32  ;;  %v1498_v42 = vpop.f32.mrf.mxu0  ;;  %v2188_v62 = vadd.f32 %v4210_v39, %v5317_v12 }
 0x13b   : > { %v4347_v43 = vpop.eup %4346  ;;  %v1828_v44 = vpop.f32.mrf.mxu1  ;;  %v2443_v45 = vmul.f32 %v4345_v40, %v5332_v37  ;;  %4364 = vtanh.f32 %v2185_v38  ;;  %v2121_v52 = vadd.f32 %v1498_v42, %v5317_v12 }
 0x13c   : > { %v4114_v46 = vpop.f32.mrf.mxu0  ;;  %v2442_v47 = vmul.f32 %v4347_v43, %v5332_v37  ;;  %4366 = vtanh.f32 %v2186_v41  ;;  %v2187_v63 = vadd.f32 %v1828_v44, %v5317_v12 }
 0x13d   : > { %v4349_v48 = vpop.eup %4348  ;;  %v4213_v50 = vpop.f32.mrf.mxu1  ;;  %v2698_v51 = vsel %vm2508_vm2, %v2443_v45, 0.0  ;;  %4368 = vtanh.f32 %v2122_v49  ;;  %v2124_v9 = vadd.f32 %v4114_v46, %v5317_v12 }
 0x13e   : > { %2699 = vadd.xlane.f32.xlu1 %v2698_v51  ;;  %v2695_v53 = vsel %vm2508_vm2, %v2442_v47, 0.0  ;;  %v1508_v54 = vpop.f32.mrf.mxu0  ;;  %v2445_v55 = vmul.f32 %v4349_v48, %v5332_v37  ;;  %4370 = vtanh.f32 %v2121_v52  ;;  %v2190_v21 = vadd.f32 %v4213_v50, %v5317_v12 }
 0x13f   : > { %v4351_v56 = vpop.eup %4350  ;;  %2696 = vadd.xlane.f32.xlu0 %v2695_v53  ;;  %v1838_v57 = vpop.f32.mrf.mxu1  ;;  %4372 = vtanh.f32 %v2188_v62  ;;  %v2123_v14 = vadd.f32 %v1508_v54, %v5317_v12 }
 0x140   : > { %v4353_v58 = vpop.eup %4352  ;;  %v4117_v59 = vpop.f32.mrf.mxu0  ;;  %v2444_v60 = vmul.f32 %v4351_v56, %v5332_v37  ;;  %v2704_v0 = vsel %vm2508_vm2, %v2445_v55, 0.0  ;;  %4374 = vtanh.f32 %v2187_v63  ;;  %v2189_v25 = vadd.f32 %v1838_v57, %v5317_v12 }
 0x141   : > { %v4355_v61 = vpop.eup %4354  ;;  %v4216_v1 = vpop.f32.mrf.mxu1  ;;  %v2381_v5 = vmul.f32 %v4353_v58, %v5332_v37  ;;  %4376 = vtanh.f32 %v2124_v9  ;;  %v2126_v31 = vadd.f32 %v4117_v59, %v5317_v12 }
 0x142   : > { %2705 = vadd.xlane.f32.xlu1 %v2704_v0  ;;  %v2701_v2 = vsel %vm2508_vm2, %v2444_v60, 0.0  ;;  %v1518_v3 = vpop.f32.mrf.mxu0  ;;  %v2447_v4 = vmul.f32 %v4355_v61, %v5332_v37  ;;  %v4357_v6 = vpop.eup %4356  ;;  %4378 = vtanh.f32 %v2123_v14  ;;  %v2192_v42 = vadd.f32 %v4216_v1, %v5317_v12 }
 0x143   : > { %2702 = vadd.xlane.f32.xlu0 %v2701_v2  ;;  %v1848_v15 = vpop.f32.mrf.mxu1  ;;  %v2512_v16 = vsel %vm2508_vm2, %v2381_v5, 0.0  ;;  %v2380_v18 = vmul.f32 %v4357_v6, %v5332_v37  ;;  %4380 = vtanh.f32 %v2190_v21  ;;  %v2125_v35 = vadd.f32 %v1518_v3, %v5317_v12 }
 0x144   : > { %v4359_v7 = vpop.eup %4358  ;;  %v4120_v8 = vpop.f32.mrf.mxu0  ;;  %v2710_v10 = vsel %vm2508_vm2, %v2447_v4, 0.0  ;;  %4382 = vtanh.f32 %v2189_v25  ;;  %v2191_v46 = vadd.f32 %v1848_v15, %v5317_v12 }
 0x145   : > { %v2383_v11 = vmul.f32 %v4359_v7, %v5332_v37  ;;  %v4219_v26 = vpop.f32.mrf.mxu1  ;;  %v2509_v27 = vsel %vm2508_vm2, %v2380_v18, 0.0  ;;  %4384 = vtanh.f32 %v2126_v31  ;;  %v2128_v52 = vadd.f32 %v4120_v8, %v5317_v12 }
 0x146   : > { %v4361_v13 = vpop.eup %4360  ;;  %2711 = vadd.xlane.f32.xlu1 %v2710_v10  ;;  %v5355_v17 = vpop.f32.mrf.mxu0  ;;  %4386 = vtanh.f32 %v2125_v35  ;;  %v2194_v56 = vadd.f32 %v4219_v26, %v5317_v12 }
 0x147   : > { %v4363_v19 = vpop.eup %4362  ;;  %2513 = vadd.xlane.f32.xlu0 %v2512_v16  ;;  %v2518_v22 = vsel %vm2508_vm2, %v2383_v11, 0.0  ;;  %v2382_v23 = vmul.f32 %v4361_v13, %v5332_v37  ;;  %v1858_v36 = vpop.f32.mrf.mxu1  ;;  %4388 = vtanh.f32 %v2192_v42  ;;  %v2127_v2 = vadd.f32 %v5355_v17, %v5317_v12 }
 0x148   : > { %v5358_v20 = vpop.f32.mrf.mxu0  ;;  %v4365_v24 = vpop.eup %4364  ;;  %v2446_v29 = vmul.f32 %v4363_v19, %v5332_v37  ;;  %4390 = vtanh.f32 %v2191_v46  ;;  %v2193_v62 = vadd.f32 %v1858_v36, %v5317_v12 }
 0x149   : > { %v4367_v30 = vpop.eup %4366  ;;  %v2515_v32 = vsel %vm2508_vm2, %v2382_v23, 0.0  ;;  %v2448_v33 = vmul.f32 %v4365_v24, %v5332_v37  ;;  %v4222_v47 = vpop.f32.mrf.mxu1  ;;  %4392 = vtanh.f32 %v2128_v52  ;;  %v2130_v13 = vadd.f32 %v5358_v20, %v5317_v12 }
 0x14a   : > { %2519 = vadd.xlane.f32.xlu1 %v2518_v22  ;;  %v5365_v28 = vpop.f32.mrf.mxu0  ;;  %v4369_v34 = vpop.eup %4368  ;;  %v2707_v39 = vsel %vm2508_vm2, %v2446_v29, 0.0  ;;  %v2449_v40 = vmul.f32 %v4367_v30, %v5332_v37  ;;  %4394 = vtanh.f32 %v2194_v56  ;;  %v2196_v8 = vadd.f32 %v4222_v47, %v5317_v12 }
 0x14b   : > { %2510 = vadd.xlane.f32.xlu0 %v2509_v27  ;;  %v4371_v41 = vpop.eup %4370  ;;  %v2713_v43 = vsel %vm2508_vm2, %v2448_v33, 0.0  ;;  %v2385_v44 = vmul.f32 %v4369_v34, %v5332_v37  ;;  %v1868_v57 = vpop.f32.mrf.mxu1  ;;  %4396 = vtanh.f32 %v2193_v62  ;;  %v2129_v20 = vadd.f32 %v5365_v28, %v5317_v12 }
 0x14c   : > { %v5372_v38 = vpop.f32.mrf.mxu0  ;;  %v4373_v45 = vpop.eup %4372  ;;  %v2716_v49 = vsel %vm2508_vm2, %v2449_v40, 0.0  ;;  %v2384_v50 = vmul.f32 %v4371_v41, %v5332_v37  ;;  %4398 = vtanh.f32 %v2127_v2  ;;  %v2195_v28 = vadd.f32 %v1868_v57, %v5317_v12 }
 0x14d   : > { %v4375_v51 = vpop.eup %4374  ;;  %v2524_v53 = vsel %vm2508_vm2, %v2385_v44, 0.0  ;;  %v2451_v54 = vmul.f32 %v4373_v45, %v5332_v37  ;;  %v4225_v3 = vpop.f32.mrf.mxu1  ;;  %4400 = vtanh.f32 %v2196_v8  ;;  %v2132_v19 = vadd.f32 %v5372_v38, %v5317_v12 }
 0x14e   : > { %2516 = vadd.xlane.f32.xlu1 %v2515_v32  ;;  %v5380_v48 = vpop.f32.mrf.mxu0  ;;  %v4377_v55 = vpop.eup %4376  ;;  %v2521_v59 = vsel %vm2508_vm2, %v2384_v50, 0.0  ;;  %v2450_v60 = vmul.f32 %v4375_v51, %v5332_v37  ;;  %4402 = vtanh.f32 %v2130_v13  ;;  %v2198_v30 = vadd.f32 %v4225_v3, %v5317_v12 }
 0x14f   : > { %2708 = vadd.xlane.f32.xlu0 %v2707_v39  ;;  %v4379_v61 = vpop.eup %4378  ;;  %v2722_v63 = vsel %vm2508_vm2, %v2451_v54, 0.0  ;;  %v2387_v0 = vmul.f32 %v4377_v55, %v5332_v37  ;;  %v1878_v14 = vpop.f32.mrf.mxu1  ;;  %4404 = vtanh.f32 %v2132_v19  ;;  %v2131_v44 = vadd.f32 %v5380_v48, %v5317_v12 }
 0x150   : > { %v5388_v58 = vpop.f32.mrf.mxu0  ;;  %v4381_v1 = vpop.eup %4380  ;;  %v2719_v5 = vsel %vm2508_vm2, %v2450_v60, 0.0  ;;  %v2386_v6 = vmul.f32 %v4379_v61, %v5332_v37  ;;  %4406 = vtanh.f32 %v2129_v20  ;;  %v2197_v48 = vadd.f32 %v1878_v14, %v5317_v12 }
 0x151   : > { %v4383_v7 = vpop.eup %4382  ;;  %v2530_v9 = vsel %vm2508_vm2, %v2387_v0, 0.0  ;;  %v2453_v10 = vmul.f32 %v4381_v1, %v5332_v37  ;;  %v4228_v24 = vpop.f32.mrf.mxu1  ;;  %4408 = vtanh.f32 %v2198_v30  ;;  %v2134_v40 = vadd.f32 %v5388_v58, %v5317_v12 }
 0x152   : > { %2714 = vadd.xlane.f32.xlu1 %v2713_v43  ;;  %v5397_v4 = vpop.f32.mrf.mxu0  ;;  %v4385_v11 = vpop.eup %4384  ;;  %v2527_v16 = vsel %vm2508_vm2, %v2386_v6, 0.0  ;;  %v2452_v17 = vmul.f32 %v4383_v7, %v5332_v37  ;;  %4410 = vtanh.f32 %v2195_v28  ;;  %v2200_v51 = vadd.f32 %v4228_v24, %v5317_v12 }
 0x153   : > { %2717 = vadd.xlane.f32.xlu0 %v2716_v49  ;;  %v4387_v18 = vpop.eup %4386  ;;  %v2728_v21 = vsel %vm2508_vm2, %v2453_v10, 0.0  ;;  %v2389_v22 = vmul.f32 %v4385_v11, %v5332_v37  ;;  %v1888_v34 = vpop.f32.mrf.mxu1  ;;  %4412 = vtanh.f32 %v2134_v40  ;;  %v2133_v0 = vadd.f32 %v5397_v4, %v5317_v12 }
 0x154   : > { %v5406_v15 = vpop.f32.mrf.mxu0  ;;  %v4389_v23 = vpop.eup %4388  ;;  %v2725_v26 = vsel %vm2508_vm2, %v2452_v17, 0.0  ;;  %v2388_v27 = vmul.f32 %v4387_v18, %v5332_v37  ;;  %4414 = vtanh.f32 %v2131_v44  ;;  %v2199_v4 = vadd.f32 %v1888_v34, %v5317_v12 }
 0x155   : > { %v4391_v29 = vpop.eup %4390  ;;  %v2536_v31 = vsel %vm2508_vm2, %v2389_v22, 0.0  ;;  %v2455_v32 = vmul.f32 %v4389_v23, %v5332_v37  ;;  %v4231_v45 = vpop.f32.mrf.mxu1  ;;  %4416 = vtanh.f32 %v2200_v51  ;;  %v2136_v60 = vadd.f32 %v5406_v15, %v5317_v12 }
 0x156   : > { %2525 = vadd.xlane.f32.xlu1 %v2524_v53  ;;  %v5416_v25 = vpop.f32.mrf.mxu0  ;;  %v4393_v33 = vpop.eup %4392  ;;  %v2533_v36 = vsel %vm2508_vm2, %v2388_v27, 0.0  ;;  %v2454_v38 = vmul.f32 %v4391_v29, %v5332_v37  ;;  %4418 = vtanh.f32 %v2197_v48  ;;  %v2202_v22 = vadd.f32 %v4231_v45, %v5317_v12 }
 0x157   : > { %2522 = vadd.xlane.f32.xlu0 %v2521_v59  ;;  %v4395_v39 = vpop.eup %4394  ;;  %v2734_v41 = vsel %vm2508_vm2, %v2455_v32, 0.0  ;;  %v2391_v42 = vmul.f32 %v4393_v33, %v5332_v37  ;;  %v1898_v55 = vpop.f32.mrf.mxu1  ;;  %4420 = vtanh.f32 %v2136_v60  ;;  %v2135_v7 = vadd.f32 %v5416_v25, %v5317_v12 }
 0x158   : > { %v5424_v35 = vpop.f32.mrf.mxu0  ;;  %v4397_v43 = vpop.eup %4396  ;;  %v2731_v47 = vsel %vm2508_vm2, %v2454_v38, 0.0  ;;  %v2457_v49 = vmul.f32 %v4395_v39, %v5332_v37  ;;  %4422 = vtanh.f32 %v2133_v0  ;;  %v2201_v17 = vadd.f32 %v1898_v55, %v5317_v12 }
 0x159   : > { %v4399_v50 = vpop.eup %4398  ;;  %v2542_v52 = vsel %vm2508_vm2, %v2391_v42, 0.0  ;;  %v2456_v53 = vmul.f32 %v4397_v43, %v5332_v37  ;;  %v4234_v1 = vpop.f32.mrf.mxu1  ;;  %4424 = vtanh.f32 %v2135_v7  ;;  %v2138_v32 = vadd.f32 %v5424_v35, %v5317_v12 }
 0x15a   : > { %2723 = vadd.xlane.f32.xlu1 %v2722_v63  ;;  %v5434_v46 = vpop.f32.mrf.mxu0  ;;  %v4401_v54 = vpop.eup %4400  ;;  %v2740_v57 = vsel %vm2508_vm2, %v2457_v49, 0.0  ;;  %v2390_v58 = vmul.f32 %v4399_v50, %v5332_v37  ;;  %4426 = vtanh.f32 %v2199_v4  ;;  %v2204_v27 = vadd.f32 %v4234_v1, %v5317_v12 }
 0x15b   : > { %2720 = vadd.xlane.f32.xlu0 %v2719_v5  ;;  %v4403_v59 = vpop.eup %4402  ;;  %v2737_v61 = vsel %vm2508_vm2, %v2456_v53, 0.0  ;;  %v2459_v62 = vmul.f32 %v4401_v54, %v5332_v37  ;;  %v1908_v11 = vpop.f32.mrf.mxu1  ;;  %4428 = vtanh.f32 %v2201_v17  ;;  %v2137_v39 = vadd.f32 %v5434_v46, %v5317_v12 }
 0x15c   : > { %v5442_v56 = vpop.f32.mrf.mxu0  ;;  %v4405_v63 = vpop.eup %4404  ;;  %v2539_v3 = vsel %vm2508_vm2, %v2390_v58, 0.0  ;;  %v2393_v5 = vmul.f32 %v4403_v59, %v5332_v37  ;;  %4430 = vtanh.f32 %v2202_v22  ;;  %v2203_v35 = vadd.f32 %v1908_v11, %v5317_v12 }
 0x15d   : > { %v4407_v6 = vpop.eup %4406  ;;  %v2746_v8 = vsel %vm2508_vm2, %v2459_v62, 0.0  ;;  %v4237_v23 = vpop.f32.mrf.mxu1  ;;  %4432 = vtanh.f32 %v2204_v27  ;;  %v2140_v46 = vadd.f32 %v5442_v56, %v5317_v12 }
 0x15e   : > { %2531 = vadd.xlane.f32.xlu1 %v2530_v9  ;;  %v5452_v2 = vpop.f32.mrf.mxu0  ;;  %v2395_v9 = vmul.f32 %v4405_v63, %v5332_v37  ;;  %v4409_v10 = vpop.eup %4408  ;;  %v2548_v14 = vsel %vm2508_vm2, %v2393_v5, 0.0  ;;  %v2392_v15 = vmul.f32 %v4407_v6, %v5332_v37  ;;  %4434 = vtanh.f32 %v2138_v32 }
 0x15f   : > { %2528 = vadd.xlane.f32.xlu0 %v2527_v16  ;;  %v4411_v16 = vpop.eup %4410  ;;  %v2461_v19 = vmul.f32 %v4409_v10, %v5332_v37  ;;  %v1918_v33 = vpop.f32.mrf.mxu1  ;;  %4436 = vtanh.f32 %v2137_v39  ;;  %v2139_v53 = vadd.f32 %v5452_v2, %v5317_v12  ;;  %v2206_v56 = vadd.f32 %v4237_v23, %v5317_v12 }
 0x160   : > { %v5461_v13 = vpop.f32.mrf.mxu0  ;;  %v2554_v18 = vsel %vm2508_vm2, %v2395_v9, 0.0  ;;  %v2545_v24 = vsel %vm2508_vm2, %v2392_v15, 0.0  ;;  %v2458_v25 = vmul.f32 %v4411_v16, %v5332_v37  ;;  %4438 = vtanh.f32 %v2203_v35 }
 0x161   : > { %v2752_v29 = vsel %vm2508_vm2, %v2461_v19, 0.0  ;;  %v4240_v43 = vpop.f32.mrf.mxu1  ;;  %4440 = vtanh.f32 %v2140_v46  ;;  %v2205_v62 = vadd.f32 %v1918_v33, %v5317_v12  ;;  %v2142_v5 = vadd.f32 %v5461_v13, %v5317_v12 }
 0x162   : > { %2729 = vadd.xlane.f32.xlu1 %v2728_v21  ;;  %v4413_v21 = vpop.eup %4412  ;;  %v5469_v20 = vpop.f32.mrf.mxu0  ;;  %v2743_v34 = vsel %vm2508_vm2, %v2458_v25, 0.0  ;;  %4442 = vtanh.f32 %v2139_v53  ;;  %v2208_v13 = vadd.f32 %v4240_v43, %v5317_v12 }
 0x163   : > { %2726 = vadd.xlane.f32.xlu0 %v2725_v26  ;;  %v4415_v26 = vpop.eup %4414  ;;  %v2397_v30 = vmul.f32 %v4413_v21, %v5332_v37  ;;  %v1928_v54 = vpop.f32.mrf.mxu1  ;;  %4444 = vtanh.f32 %v2206_v56  ;;  %v2141_v9 = vadd.f32 %v5469_v20, %v5317_v12 }
 0x164   : > { %v5478_v28 = vpop.f32.mrf.mxu0  ;;  %4446 = vtanh.f32 %v2205_v62  ;;  %v2207_v19 = vadd.f32 %v1928_v54, %v5317_v12 }
 0x165   : > { %v2560_v40 = vsel %vm2508_vm2, %v2397_v30, 0.0  ;;  %v4243_v63 = vpop.f32.mrf.mxu1  ;;  %v2144_v25 = vadd.f32 %v5478_v28, %v5317_v12 }
 0x166   : > { %2537 = vadd.xlane.f32.xlu1 %v2536_v31  ;;  %v4417_v31 = vpop.eup %4416  ;;  %v5487_v44 = vpop.f32.mrf.mxu0  ;;  %4448 = vtanh.f32 %v2142_v5  ;;  %v2210_v30 = vadd.f32 %v4243_v63, %v5317_v12 }
 0x167   : > { %2534 = vadd.xlane.f32.xlu0 %v2533_v36  ;;  %v2394_v36 = vmul.f32 %v4415_v26, %v5332_v37  ;;  %v4419_v38 = vpop.eup %4418  ;;  %v1938_v10 = vpop.f32.mrf.mxu1  ;;  %4450 = vtanh.f32 %v2141_v9 }
 0x168   : > { %v4421_v42 = vpop.eup %4420  ;;  %v5497_v48 = vpop.f32.mrf.mxu0  ;;  %4452 = vtanh.f32 %v2208_v13  ;;  %v2209_v28 = vadd.f32 %v1938_v10, %v5317_v12 }
 0x169   : > { %v2551_v45 = vsel %vm2508_vm2, %v2394_v36, 0.0  ;;  %v4423_v49 = vpop.eup %4422  ;;  %v2399_v51 = vmul.f32 %v4421_v42, %v5332_v37  ;;  %v4246_v21 = vpop.f32.mrf.mxu1  ;;  %4454 = vtanh.f32 %v2207_v19 }
 0x16a   : > { %2735 = vadd.xlane.f32.xlu1 %v2734_v41  ;;  %v2463_v41 = vmul.f32 %v4417_v31, %v5332_v37  ;;  %v5505_v0 = vpop.f32.mrf.mxu0 }
 0x16b   : > { %2732 = vadd.xlane.f32.xlu0 %v2731_v47  ;;  %v2460_v47 = vmul.f32 %v4419_v38, %v5332_v37  ;;  %v2566_v59 = vsel %vm2508_vm2, %v2399_v51, 0.0  ;;  %v1948_v31 = vpop.f32.mrf.mxu1 }
 0x16c   : > { %v2758_v50 = vsel %vm2508_vm2, %v2463_v41, 0.0  ;;  %v5515_v4 = vpop.f32.mrf.mxu0  ;;  %v2143_v41 = vadd.f32 %v5487_v44, %v5317_v12  ;;  %v2146_v44 = vadd.f32 %v5497_v48, %v5317_v12  ;;  %v2211_v48 = vadd.f32 %v1948_v31, %v5317_v12 }
 0x16d   : > { %v2749_v55 = vsel %vm2508_vm2, %v2460_v47, 0.0  ;;  %v4249_v42 = vpop.f32.mrf.mxu1 }
 0x16e   : > { %2543 = vadd.xlane.f32.xlu1 %v2542_v52  ;;  %v4425_v52 = vpop.eup %4424  ;;  %v5523_v22 = vpop.f32.mrf.mxu0  ;;  %4456 = vtanh.f32 %v2144_v25 }
 0x16f   : > { %2741 = vadd.xlane.f32.xlu0 %v2740_v57  ;;  %v2396_v57 = vmul.f32 %v4423_v49, %v5332_v37  ;;  %v4427_v58 = vpop.eup %4426  ;;  %v2398_v60 = vmul.f32 %v4425_v52, %v5332_v37  ;;  %4458 = vtanh.f32 %v2210_v30  ;;  %v2212_v49 = vadd.f32 %v4246_v21, %v5317_v12  ;;  %v1958_v52 = vpop.f32.mrf.mxu1 }
 0x170   : > { %v2462_v2 = vmul.f32 %v4427_v58, %v5332_v37  ;;  %v5532_v32 = vpop.f32.mrf.mxu0  ;;  %v2145_v58 = vadd.f32 %v5505_v0, %v5317_v12  ;;  %v2148_v0 = vadd.f32 %v5515_v4, %v5317_v12  ;;  %v2214_v4 = vadd.f32 %v4249_v42, %v5317_v12 }
 0x171   : > { %v2557_v1 = vsel %vm2508_vm2, %v2396_v57, 0.0  ;;  %v2563_v6 = vsel %vm2508_vm2, %v2398_v60, 0.0 }
 0x172   : > { %2738 = vadd.xlane.f32.xlu1 %v2737_v61  ;;  %v4429_v61 = vpop.eup %4428  ;;  %v2755_v11 = vsel %vm2508_vm2, %v2462_v2, 0.0  ;;  %v5541_v35 = vpop.f32.mrf.mxu0  ;;  %4460 = vtanh.f32 %v2209_v28 }
 0x173   : > { %2540 = vadd.xlane.f32.xlu0 %v2539_v3  ;;  %v4431_v3 = vpop.eup %4430  ;;  %v2464_v7 = vmul.f32 %v4429_v61, %v5332_v37  ;;  %4462 = vtanh.f32 %v2143_v41  ;;  %v4252_v61 = vpop.f32.mrf.mxu1 }
 0x174   : > { %v5550_v53 = vpop.f32.mrf.mxu0 }
 0x175   : > { %v2761_v16 = vsel %vm2508_vm2, %v2464_v7, 0.0  ;;  %v2147_v7 = vadd.f32 %v5523_v22, %v5317_v12 }
 0x176   : > { %2747 = vadd.xlane.f32.xlu1 %v2746_v8  ;;  %v4433_v8 = vpop.eup %4432  ;;  %4464 = vtanh.f32 %v2212_v49  ;;  %v5559_v62 = vpop.f32.mrf.mxu0 }
 0x177   : > { %2549 = vadd.xlane.f32.xlu0 %v2548_v14  ;;  %v2465_v14 = vmul.f32 %v4431_v3, %v5332_v37  ;;  %v4435_v15 = vpop.eup %4434  ;;  %v2467_v17 = vmul.f32 %v4433_v8, %v5332_v37  ;;  %4466 = vtanh.f32 %v2146_v44  ;;  %v1968_v8 = vpop.f32.mrf.mxu1 }
 0x178   : > { %v2401_v20 = vmul.f32 %v4435_v15, %v5332_v37  ;;  %v5569_v9 = vpop.f32.mrf.mxu0 }
 0x179   : > { %v2764_v23 = vsel %vm2508_vm2, %v2465_v14, 0.0  ;;  %v2770_v26 = vsel %vm2508_vm2, %v2467_v17, 0.0  ;;  %v2213_v17 = vadd.f32 %v1958_v52, %v5317_v12 }
 0x17a   : > { %2555 = vadd.xlane.f32.xlu1 %v2554_v18  ;;  %v4437_v18 = vpop.eup %4436  ;;  %v2572_v33 = vsel %vm2508_vm2, %v2401_v20, 0.0  ;;  %4468 = vtanh.f32 %v2145_v58  ;;  %v5577_v19 = vpop.f32.mrf.mxu0  ;;  %v2150_v20 = vadd.f32 %v5532_v32, %v5317_v12  ;;  %v2216_v32 = vadd.f32 %v4252_v61, %v5317_v12 }
 0x17b   : > { %2546 = vadd.xlane.f32.xlu0 %v2545_v24  ;;  %v4439_v24 = vpop.eup %4438  ;;  %v2400_v27 = vmul.f32 %v4437_v18, %v5332_v37  ;;  %4470 = vtanh.f32 %v2211_v48  ;;  %v4255_v18 = vpop.f32.mrf.mxu1 }
 0x17c   : > { %v5587_v30 = vpop.f32.mrf.mxu0 }
 0x17d   : > { %v2569_v38 = vsel %vm2508_vm2, %v2400_v27, 0.0  ;;  %v2149_v27 = vadd.f32 %v5541_v35, %v5317_v12 }
 0x17e   : > { %2753 = vadd.xlane.f32.xlu1 %v2752_v29  ;;  %v4441_v29 = vpop.eup %4440  ;;  %4472 = vtanh.f32 %v2148_v0  ;;  %v5595_v41 = vpop.f32.mrf.mxu0 }
 0x17f   : > { %2744 = vadd.xlane.f32.xlu0 %v2743_v34  ;;  %v2466_v34 = vmul.f32 %v4439_v24, %v5332_v37  ;;  %v4443_v36 = vpop.eup %4442  ;;  %v2403_v39 = vmul.f32 %v4441_v29, %v5332_v37  ;;  %4474 = vtanh.f32 %v2147_v7  ;;  %v1978_v29 = vpop.f32.mrf.mxu1 }
 0x180   : > { %v5604_v44 = vpop.f32.mrf.mxu0 }
 0x181   : > { %v2767_v43 = vsel %vm2508_vm2, %v2466_v34, 0.0  ;;  %v2578_v46 = vsel %vm2508_vm2, %v2403_v39, 0.0  ;;  %v2215_v39 = vadd.f32 %v1968_v8, %v5317_v12 }
 0x182   : > { %2561 = vadd.xlane.f32.xlu1 %v2560_v40  ;;  %v4445_v40 = vpop.eup %4444  ;;  %4476 = vtanh.f32 %v2214_v4  ;;  %v5613_v48 = vpop.f32.mrf.mxu0 }
 0x183   : > { %2552 = vadd.xlane.f32.xlu0 %v2551_v45  ;;  %v2402_v45 = vmul.f32 %v4443_v36, %v5332_v37  ;;  %v4447_v47 = vpop.eup %4446  ;;  %4478 = vtanh.f32 %v2213_v17 }
 0x184   : > { %v4449_v51 = vpop.eup %4448  ;;  %4480 = vtanh.f32 %v2150_v20  ;;  %v5622_v7 = vpop.f32.mrf.mxu0  ;;  %v2155_v20 = vadd.f32 %v5595_v41, %v5317_v12  ;;  %v5657_v41 = vld [vmem:[%s6224_s5] ss:$0 sm:$0xff] }
 0x185   : > { %v2575_v54 = vsel %vm2508_vm2, %v2402_v45, 0.0  ;;  %v4451_v57 = vpop.eup %4450  ;;  %4482 = vtanh.f32 %v2149_v27  ;;  %v2152_v45 = vadd.f32 %v5550_v53, %v5317_v12  ;;  %v2217_v53 = vadd.f32 %v1978_v29, %v5317_v12 }
 0x186   : > { %2759 = vadd.xlane.f32.xlu1 %v2758_v50  ;;  %v2469_v50 = vmul.f32 %v4445_v40, %v5332_v37  ;;  %v4453_v60 = vpop.eup %4452  ;;  %v4258_v40 = vpop.f32.mrf.mxu1  ;;  %4484 = vtanh.f32 %v2216_v32 }
 0x187   : > { %2750 = vadd.xlane.f32.xlu0 %v2749_v55  ;;  %v2468_v55 = vmul.f32 %v4447_v47, %v5332_v37  ;;  %v4455_v2 = vpop.eup %4454  ;;  %v2471_v5 = vmul.f32 %v4453_v60, %v5332_v37  ;;  %4486 = vtanh.f32 %v2215_v39  ;;  %v5633_v17 = vpop.f32.mrf.mxu0 }
 0x188   : > { %v2776_v56 = vsel %vm2508_vm2, %v2469_v50, 0.0  ;;  %v2218_v50 = vadd.f32 %v4255_v18, %v5317_v12 }
 0x189   : > { %v2773_v63 = vsel %vm2508_vm2, %v2468_v55, 0.0  ;;  %v2782_v15 = vsel %vm2508_vm2, %v2471_v5, 0.0  ;;  %v5643_v29 = vpop.f32.mrf.mxu0 }
 0x18a   : > { %2567 = vadd.xlane.f32.xlu1 %v2566_v59  ;;  %v2405_v59 = vmul.f32 %v4449_v51, %v5332_v37  ;;  %v1988_v51 = vpop.f32.mrf.mxu1 }
 0x18b   : > { %2558 = vadd.xlane.f32.xlu0 %v2557_v1  ;;  %v2404_v1 = vmul.f32 %v4451_v57, %v5332_v37  ;;  %v2219_v4 = vadd.f32 %v1988_v51, %v5317_v12 }
 0x18c   : > { %v2584_v3 = vsel %vm2508_vm2, %v2405_v59, 0.0  ;;  %v2151_v59 = vadd.f32 %v5559_v62, %v5317_v12  ;;  %v4261_v60 = vpop.f32.mrf.mxu1  ;;  %v2154_v62 = vadd.f32 %v5569_v9, %v5317_v12 }
 0x18d   : > { %v2581_v10 = vsel %vm2508_vm2, %v2404_v1, 0.0 }
 0x18e   : > { %2564 = vadd.xlane.f32.xlu1 %v2563_v6  ;;  %v4457_v6 = vpop.eup %4456  ;;  %4488 = vtanh.f32 %v2152_v45 }
 0x18f   : > { %2756 = vadd.xlane.f32.xlu0 %v2755_v11  ;;  %v2470_v11 = vmul.f32 %v4455_v2, %v5332_v37  ;;  %v4459_v14 = vpop.eup %4458  ;;  %v2407_v13 = vmul.f32 %v4457_v6, %v5332_v37  ;;  %4490 = vtanh.f32 %v2218_v50  ;;  %v2220_v2 = vadd.f32 %v4258_v40, %v5317_v12  ;;  %v1998_v6 = vpop.f32.mrf.mxu1 }
 0x190   : > { %v2473_v22 = vmul.f32 %v4459_v14, %v5332_v37  ;;  %v2153_v14 = vadd.f32 %v5577_v19, %v5317_v12  ;;  %v2221_v39 = vadd.f32 %v1998_v6, %v5317_v12 }
 0x191   : > { %v2779_v21 = vsel %vm2508_vm2, %v2470_v11, 0.0  ;;  %v2590_v24 = vsel %vm2508_vm2, %v2407_v13, 0.0 }
 0x192   : > { %2762 = vadd.xlane.f32.xlu1 %v2761_v16  ;;  %v4461_v16 = vpop.eup %4460  ;;  %v2788_v31 = vsel %vm2508_vm2, %v2473_v22, 0.0  ;;  %4492 = vtanh.f32 %v2217_v53  ;;  %v3021_v22 = vlaneseq }
 0x193   : > { %2765 = vadd.xlane.f32.xlu0 %v2764_v23  ;;  %v4463_v23 = vpop.eup %4462  ;;  %v2472_v25 = vmul.f32 %v4461_v16, %v5332_v37  ;;  %4494 = vtanh.f32 %v2151_v59  ;;  %v5631_v16 = vpop.f32.mrf.mxu1 }
 0x195   : > { %v2785_v36 = vsel %vm2508_vm2, %v2472_v25, 0.0  ;;  %v2008_v27 = vpop.f32.mrf.mxu1 }
 0x196   : > { %2771 = vadd.xlane.f32.xlu1 %v2770_v26  ;;  %v4465_v26 = vpop.eup %4464  ;;  %4496 = vtanh.f32 %v2220_v2 }
 0x197   : > { %2573 = vadd.xlane.f32.xlu0 %v2572_v33  ;;  %v2406_v33 = vmul.f32 %v4463_v23, %v5332_v37  ;;  %v4467_v34 = vpop.eup %4466  ;;  %v2475_v28 = vmul.f32 %v4465_v26, %v5332_v37  ;;  %4498 = vtanh.f32 %v2154_v62  ;;  %v2156_v23 = vadd.f32 %v5587_v30, %v5317_v12 }
 0x198   : > { %v2409_v35 = vmul.f32 %v4467_v34, %v5332_v37  ;;  %v3024_v34 = vshrl.u32 %v3021_v22, 7 }
 0x199   : > { %v2587_v42 = vsel %vm2508_vm2, %v2406_v33, 0.0  ;;  %v2794_v47 = vsel %vm2508_vm2, %v2475_v28, 0.0  ;;  %v3022_v33 = vand.u32 127, %v3021_v22  ;;  %v2222_v28 = vadd.f32 %v4261_v60, %v5317_v12 }
 0x19a   : > { %2570 = vadd.xlane.f32.xlu1 %v2569_v38  ;;  %v4469_v38 = vpop.eup %4468  ;;  %v2596_v52 = vsel %vm2508_vm2, %v2409_v35, 0.0  ;;  %4500 = vtanh.f32 %v2153_v14  ;;  %v4267_v35 = vpop.f32.mrf.mxu1 }
 0x19b   : > { %2768 = vadd.xlane.f32.xlu0 %v2767_v43  ;;  %v4471_v43 = vpop.eup %4470  ;;  %v2408_v49 = vmul.f32 %v4469_v38, %v5332_v37  ;;  %4502 = vtanh.f32 %v2219_v4  ;;  %v5662_v45 = vsub.s32 %v3022_v33, %v3024_v34 }
 0x19c   : > { %v2018_v59 = vpop.f32.mrf.mxu1 }
 0x19d   : > { %v2593_v57 = vsel %vm2508_vm2, %v2408_v49, 0.0  ;;  %v2225_v34 = vadd.f32 %v2018_v59, %v5317_v12 }
 0x19e   : > { %2579 = vadd.xlane.f32.xlu1 %v2578_v46  ;;  %v4473_v46 = vpop.eup %4472  ;;  %4504 = vtanh.f32 %v2156_v23 }
 0x19f   : > { %2576 = vadd.xlane.f32.xlu0 %v2575_v54  ;;  %v2474_v54 = vmul.f32 %v4471_v43, %v5332_v37  ;;  %v4475_v55 = vpop.eup %4474  ;;  %v2411_v58 = vmul.f32 %v4473_v46, %v5332_v37  ;;  %4506 = vtanh.f32 %v2155_v20  ;;  %v5660_v43 = vpop.f32.mrf.mxu0 }
 0x1a1   : > { %v2791_v61 = vsel %vm2508_vm2, %v2474_v54, 0.0  ;;  %v2602_v0 = vsel %vm2508_vm2, %v2411_v58, 0.0  ;;  %v2158_v54 = vadd.f32 %v5604_v44, %v5317_v12  ;;  %v5674_v60 = vpop.f32.mrf.mxu0 }
 0x1a2   : > { %2777 = vadd.xlane.f32.xlu1 %v2776_v56  ;;  %v4477_v56 = vpop.eup %4476  ;;  %4508 = vtanh.f32 %v2222_v28 }
 0x1a3   : > { %2774 = vadd.xlane.f32.xlu0 %v2773_v63  ;;  %v2410_v63 = vmul.f32 %v4475_v55, %v5332_v37  ;;  %v4479_v1 = vpop.eup %4478  ;;  %4510 = vtanh.f32 %v2221_v39 }
 0x1a4   : > { %v4481_v5 = vpop.eup %4480  ;;  %4512 = vtanh.f32 %v2158_v54 }
 0x1a5   : > { %v2599_v8 = vsel %vm2508_vm2, %v2410_v63, 0.0  ;;  %v4483_v11 = vpop.eup %4482  ;;  %v2413_v9 = vmul.f32 %v4481_v5, %v5332_v37 }
 0x1a6   : > { %2585 = vadd.xlane.f32.xlu1 %v2584_v3  ;;  %v2477_v3 = vmul.f32 %v4477_v56, %v5332_v37  ;;  %v4485_v13 = vpop.eup %4484  ;;  %v2157_v56 = vadd.f32 %v5613_v48, %v5317_v12 }
 0x1a7   : > { %2582 = vadd.xlane.f32.xlu0 %v2581_v10  ;;  %v2476_v10 = vmul.f32 %v4479_v1, %v5332_v37  ;;  %v4487_v19 = vpop.eup %4486  ;;  %v2479_v25 = vmul.f32 %v4485_v13, %v5332_v37  ;;  %v2226_v13 = vadd.f32 %v4267_v35, %v5317_v12 }
 0x1a8   : > { %v4489_v26 = vpop.eup %4488  ;;  %v2478_v32 = vmul.f32 %v4487_v19, %v5332_v37  ;;  %4514 = vtanh.f32 %v2157_v56  ;;  %v2161_v56 = vadd.f32 %v5660_v43, %v5317_v12 }
 0x1a9   : > { %v2797_v18 = vsel %vm2508_vm2, %v2476_v10, 0.0  ;;  %v4491_v30 = vpop.eup %4490  ;;  %v2806_v40 = vsel %vm2508_vm2, %v2479_v25, 0.0  ;;  %v5686_v10 = vpop.f32.mrf.mxu1 }
 0x1aa   : > { %2783 = vadd.xlane.f32.xlu1 %v2782_v15  ;;  %v2800_v15 = vsel %vm2508_vm2, %v2477_v3, 0.0  ;;  %v2481_v49 = vmul.f32 %v5657_v41, %v4491_v30 }
 0x1ab   : > { %2780 = vadd.xlane.f32.xlu0 %v2779_v21  ;;  %v2412_v21 = vmul.f32 %v4483_v11, %v5332_v37  ;;  %v2415_v37 = vmul.f32 %v5657_v41, %v4489_v26  ;;  %v5688_v11 = vpop.f32.mrf.mxu0  ;;  %v5699_v20 = vpop.f32.mrf.mxu1 }
 0x1ad   : > { %v2614_v53 = vsel %vm2508_vm2, %v2415_v37, 0.0 }
 0x1ae   : > { %2591 = vadd.xlane.f32.xlu1 %v2590_v24  ;;  %v2608_v24 = vsel %vm2508_vm2, %v2413_v9, 0.0 }
 0x1af   : > { %2789 = vadd.xlane.f32.xlu0 %v2788_v31  ;;  %v2605_v31 = vsel %vm2508_vm2, %v2412_v21, 0.0 }
 0x1b2   : > { %2786 = vadd.xlane.f32.xlu1 %v2785_v36 }
 0x1b3   : > { %2588 = vadd.xlane.f32.xlu0 %v2587_v42  ;;  %v4493_v42 = vpop.eup %4492 }
 0x1b4   : > { %v4495_v46 = vpop.eup %4494 }
 0x1b5   : > { %v4497_v58 = vpop.eup %4496  ;;  %v2414_v63 = vmul.f32 %v5657_v41, %v4495_v46 }
 0x1b6   : > { %2795 = vadd.xlane.f32.xlu1 %v2794_v47  ;;  %v2803_v47 = vsel %vm2508_vm2, %v2478_v32, 0.0  ;;  %v4499_v44 = vpop.eup %4498  ;;  %v2483_v62 = vmul.f32 %v5657_v41, %v4497_v58 }
 0x1b7   : > { %2597 = vadd.xlane.f32.xlu0 %v2596_v52  ;;  %v4501_v5 = vpop.eup %4500  ;;  %v2611_v14 = vsel %vm2508_vm2, %v2414_v63, 0.0  ;;  %v2417_v4 = vmul.f32 %v5657_v41, %v4499_v44 }
 0x1b8   : > { %v4503_v6 = vpop.eup %4502  ;;  %v2818_v22 = vsel %vm2508_vm2, %v2483_v62, 0.0  ;;  %v2416_v19 = vmul.f32 %v5657_v41, %v4501_v5 }
 0x1b9   : > { %v4505_v23 = vpop.eup %4504  ;;  %v2482_v25 = vmul.f32 %v5657_v41, %v4503_v6 }
 0x1ba   : > { %2594 = vadd.xlane.f32.xlu1 %v2593_v57  ;;  %v2480_v57 = vmul.f32 %v5657_v41, %v4493_v42  ;;  %v4507_v26 = vpop.eup %4506  ;;  %v2617_v37 = vsel %vm2508_vm2, %v2416_v19, 0.0  ;;  %v4273_v42 = vpop.f32.mrf.mxu1 }
 0x1bb   : > { %2792 = vadd.xlane.f32.xlu0 %v2791_v61  ;;  %v2812_v61 = vsel %vm2508_vm2, %v2481_v49, 0.0  ;;  %v4509_v28 = vpop.eup %4508  ;;  %v2815_v46 = vsel %vm2508_vm2, %v2482_v25, 0.0 }
 0x1bc   : > { %v2809_v48 = vsel %vm2508_vm2, %v2480_v57, 0.0  ;;  %v2485_v63 = vmul.f32 %v5657_v41, %v4509_v28  ;;  %v2163_v28 = vadd.f32 %v5688_v11, %v5317_v12 }
 0x1be   : > { %2603 = vadd.xlane.f32.xlu1 %v2602_v0  ;;  %v2224_v0 = vadd.f32 %v5631_v16, %v5317_v12 }
 0x1bf   : > { %2600 = vadd.xlane.f32.xlu0 %v2599_v8  ;;  %v2223_v8 = vadd.f32 %v2008_v27, %v5317_v12  ;;  %v2159_v27 = vadd.f32 %v5633_v17, %v5317_v12  ;;  %v2419_v17 = vmul.f32 %v5657_v41, %v4505_v23  ;;  %v2230_v23 = vadd.f32 %v4273_v42, %v5317_v12 }
 0x1c0   : > { %4516 = vtanh.f32 %v2224_v0 }
 0x1c1   : > { %4518 = vtanh.f32 %v2223_v8  ;;  %v2164_v8 = vadd.f32 %v5674_v60, %v5317_v12 }
 0x1c2   : > { %2801 = vadd.xlane.f32.xlu1 %v2800_v15  ;;  %v2160_v15 = vadd.f32 %v5622_v7, %v5317_v12  ;;  %v2620_v7 = vsel %vm2508_vm2, %v2417_v4, 0.0 }
 0x1c3   : > { %2798 = vadd.xlane.f32.xlu0 %v2797_v18 }
 0x1c4   : > { %4520 = vtanh.f32 %v2160_v15 }
 0x1c5   : > { %4522 = vtanh.f32 %v2226_v13 }
 0x1c6   : > { %2609 = vadd.xlane.f32.xlu1 %v2608_v24  ;;  %v5701_v24 = vpop.f32.mrf.mxu0  ;;  %4524 = vtanh.f32 %v2159_v27 }
 0x1c7   : > { %2606 = vadd.xlane.f32.xlu0 %v2605_v31  ;;  %v5647_v36 = vpop.xlane.xlu1 %2699  ;;  %4526 = vtanh.f32 %v2225_v34 }
 0x1c8   : > { %v5650_v38 = vpop.xlane.xlu0 %2696  ;;  %v5714_v35 = vpop.f32.mrf.mxu0  ;;  %4528 = vtanh.f32 %v2161_v56 }
 0x1ca   : > { %2807 = vadd.xlane.f32.xlu1 %v2806_v40  ;;  %v5732_v0 = vpop.f32.mrf.mxu0 }
 0x1cb   : > { %2804 = vadd.xlane.f32.xlu0 %v2803_v47  ;;  %v2706_v50 = vpop.xlane.xlu1 %2705 }
 0x1cc   : > { %v3286_v51 = vrot.slane %v2706_v50, %v5662_v45  ;;  %v2703_v52 = vpop.xlane.xlu0 %2702  ;;  %v2418_v50 = vmul.f32 %v5657_v41, %v4507_v26 }
 0x1cd   : > { %v3282_v55 = vrot.slane %v2703_v52, %v5662_v45 }
 0x1ce   : > { %2615 = vadd.xlane.f32.xlu1 %v2614_v53  ;;  %v2623_v5 = vsel %vm2508_vm2, %v2418_v50, 0.0 }
 0x1cf   : > { %v3598_v1 = vsel %vm3535_vm3, %v3286_v51, %v3282_v55  ;;  %2813 = vadd.xlane.f32.xlu0 %v2812_v61  ;;  %v5679_v2 = vpop.xlane.xlu1 %2711  ;;  %v4511_v51 = vpop.eup %4510  ;;  %v2626_v61 = vsel %vm2508_vm2, %v2419_v17, 0.0 }
 0x1d0   : > { %v2514_v3 = vpop.xlane.xlu0 %2513  ;;  %v3294_v47 = vrot.slane %v5679_v2, %v5662_v45  ;;  %v4513_v44 = vpop.eup %4512  ;;  %v2484_v43 = vmul.f32 %v5657_v41, %v4511_v51 }
 0x1d1   : > { %v3030_v18 = vrot.slane %v2514_v3, %v5662_v45  ;;  %v2038_v2 = vpop.f32.mrf.mxu1  ;;  %v2421_v13 = vmul.f32 %v5657_v41, %v4513_v44 }
 0x1d2   : > { %2810 = vadd.xlane.f32.xlu1 %v2809_v48  ;;  %v4515_v48 = vpop.eup %4514  ;;  %v2821_v60 = vsel %vm2508_vm2, %v2484_v43, 0.0 }
 0x1d3   : > { %2612 = vadd.xlane.f32.xlu0 %v2611_v14  ;;  %v2520_v9 = vpop.xlane.xlu1 %2519  ;;  %v4517_v4 = vpop.eup %4516 }
 0x1d4   : > { %v2511_v16 = vpop.xlane.xlu0 %2510  ;;  %v3038_v39 = vrot.slane %v2520_v9, %v5662_v45  ;;  %v2824_v9 = vsel %vm2508_vm2, %v2485_v63, 0.0  ;;  %v4519_v19 = vpop.eup %4518 }
 0x1d5   : > { %v3026_v21 = vrot.slane %v2511_v16, %v5662_v45  ;;  %v2227_v16 = vadd.f32 %v5699_v20, %v5317_v12  ;;  %v4521_v26 = vpop.eup %4520  ;;  %v2486_v17 = vmul.f32 %v5657_v41, %v4519_v19 }
 0x1d6   : > { %2819 = vadd.xlane.f32.xlu1 %v2818_v22  ;;  %v2420_v22 = vmul.f32 %v5657_v41, %v4515_v48 }
 0x1d7   : > { %v3536_v31 = vsel %vm3535_vm3, %v3030_v18, %v3026_v21  ;;  %2621 = vadd.xlane.f32.xlu0 %v2620_v7  ;;  %v2517_v33 = vpop.xlane.xlu1 %2516  ;;  %v4276_v18 = vpop.f32.mrf.mxu1 }
 0x1d8   : > { %v2709_v32 = vpop.xlane.xlu0 %2708  ;;  %v3034_v30 = vrot.slane %v2517_v33, %v5662_v45  ;;  %v5746_v21 = vpop.f32.mrf.mxu0  ;;  %v2232_v44 = vadd.f32 %v4276_v18, %v5317_v12 }
 0x1d9   : > { %v3290_v40 = vrot.slane %v2709_v32, %v5662_v45  ;;  %v4523_v33 = vpop.eup %4522  ;;  %v2632_v32 = vsel %vm2508_vm2, %v2421_v13, 0.0 }
 0x1da   : > { %v3538_v49 = vsel %vm3537_vm4, %v3034_v30, %v3536_v31  ;;  %2618 = vadd.xlane.f32.xlu1 %v2617_v37  ;;  %v2487_v30 = vmul.f32 %v5657_v41, %v4517_v4  ;;  %v2629_v37 = vsel %vm2508_vm2, %v2420_v22, 0.0 }
 0x1db   : > { %v3599_v52 = vsel %vm3537_vm4, %v3290_v40, %v3598_v1  ;;  %2816 = vadd.xlane.f32.xlu0 %v2815_v46  ;;  %v2715_v54 = vpop.xlane.xlu1 %2714  ;;  %v3540_v55 = vsel %vm3539_vm5, %v3038_v39, %v3538_v49  ;;  %v2162_v1 = vadd.f32 %v5643_v29, %v5317_v12  ;;  %v2048_v39 = vpop.f32.mrf.mxu1 }
 0x1dc   : > { %v2718_v53 = vpop.xlane.xlu0 %2717  ;;  %v3600_v57 = vsel %vm3539_vm5, %v3294_v47, %v3599_v52  ;;  %v3298_v58 = vrot.slane %v2715_v54, %v5662_v45  ;;  %v5759_v40 = vpop.f32.mrf.mxu0  ;;  %v2166_v52 = vadd.f32 %v5701_v24, %v5317_v12 }
 0x1dd   : > { %v3302_v59 = vrot.slane %v2718_v53, %v5662_v45  ;;  %4530 = vtanh.f32 %v2162_v1  ;;  %v4525_v49 = vpop.eup %4524  ;;  %v2423_v53 = vmul.f32 %v5657_v41, %v4521_v26 }
 0x1de   : > { %v3601_v3 = vsel %vm3541_vm6, %v3298_v58, %v3600_v57  ;;  %2627 = vadd.xlane.f32.xlu1 %v2626_v61  ;;  %4532 = vtanh.f32 %v2164_v8  ;;  %v4527_v11 = vpop.eup %4526  ;;  %v2229_v57 = vadd.f32 %v2038_v2, %v5317_v12  ;;  %v5774_v58 = vpop.f32.mrf.mxu1  ;;  %v2489_v61 = vmul.f32 %v5657_v41, %v4523_v33 }
 0x1df   : > { %2624 = vadd.xlane.f32.xlu0 %v2623_v5  ;;  %v2526_v62 = vpop.xlane.xlu1 %2525  ;;  %v3602_v6 = vsel %vm3543_vm7, %v3302_v59, %v3601_v3  ;;  %4534 = vtanh.f32 %v2227_v16  ;;  %v5776_v56 = vpop.f32.mrf.mxu0  ;;  %v2827_v59 = vsel %vm2508_vm2, %v2486_v17, 0.0  ;;  %v2638_v43 = vsel %vm2508_vm2, %v2423_v53, 0.0 }
 0x1e0   : > { %v3046_v29 = vrot.slane %v2526_v62, %v5662_v45  ;;  %v2523_v14 = vpop.xlane.xlu0 %2522  ;;  %4536 = vtanh.f32 %v2230_v23  ;;  %v2488_v48 = vmul.f32 %v5657_v41, %v4527_v11  ;;  %v4529_v62 = vpop.eup %4528  ;;  %v2422_v4 = vmul.f32 %v5657_v41, %v4525_v49 }
 0x1e1   : > { %v3042_v15 = vrot.slane %v2523_v14, %v5662_v45  ;;  %4538 = vtanh.f32 %v2163_v28  ;;  %v2058_v8 = vpop.f32.mrf.mxu1  ;;  %v2836_v14 = vsel %vm2508_vm2, %v2489_v61, 0.0  ;;  %v2168_v16 = vadd.f32 %v5732_v0, %v5317_v12 }
 0x1e2   : > { %2825 = vadd.xlane.f32.xlu1 %v2824_v9  ;;  %4540 = vtanh.f32 %v2166_v52  ;;  %v2833_v19 = vsel %vm2508_vm2, %v2488_v48, 0.0  ;;  %v2424_v23 = vmul.f32 %v5657_v41, %v4529_v62  ;;  %v2635_v0 = vsel %vm2508_vm2, %v2422_v4, 0.0 }
 0x1e3   : > { %v3542_v7 = vsel %vm3541_vm6, %v3042_v15, %v3540_v55  ;;  %2822 = vadd.xlane.f32.xlu0 %v2821_v60  ;;  %v2724_v25 = vpop.xlane.xlu1 %2723  ;;  %v2830_v55 = vsel %vm2508_vm2, %v2487_v30, 0.0  ;;  %4542 = vtanh.f32 %v2229_v57  ;;  %v2233_v28 = vadd.f32 %v2058_v8, %v5317_v12 }
 0x1e4   : > { %v3310_v27 = vrot.slane %v2724_v25, %v5662_v45  ;;  %v2721_v20 = vpop.xlane.xlu0 %2720  ;;  %v3544_v31 = vsel %vm3543_vm7, %v3046_v29, %v3542_v7  ;;  %v5791_v29 = vpop.f32.mrf.mxu0  ;;  %4544 = vtanh.f32 %v2232_v44  ;;  %v2231_v7 = vadd.f32 %v2048_v39, %v5317_v12 }
 0x1e5   : > { %v3306_v34 = vrot.slane %v2721_v20, %v5662_v45  ;;  %v5803_v25 = vpop.f32.mrf.mxu1  ;;  %v2170_v52 = vadd.f32 %v5759_v40, %v5317_v12 }
 0x1e6   : > { %2633 = vadd.xlane.f32.xlu1 %v2632_v32  ;;  %v1748_v26 = vpop.f32.mrf.mxu0 }
 0x1e7   : > { %2630 = vadd.xlane.f32.xlu0 %v2629_v37  ;;  %v2532_v42 = vpop.xlane.xlu1 %2531  ;;  %v3603_v47 = vsel %vm3545_vm8, %v3306_v34, %v3602_v6  ;;  %v2165_v6 = vadd.f32 %v5714_v35, %v5317_v12  ;;  %v2641_v37 = vsel %vm2508_vm2, %v2424_v23, 0.0 }
 0x1e8   : > { %v3054_v46 = vrot.slane %v2532_v42, %v5662_v45  ;;  %v2529_v50 = vpop.xlane.xlu0 %2528  ;;  %v5766_v51 = vsel %vm3547_vm9, %v3310_v27, %v3603_v47  ;;  %v2167_v42 = vadd.f32 %v5746_v21, %v5317_v12  ;;  %v5815_v47 = vpop.f32.mrf.mxu1  ;;  %v2169_v21 = vadd.f32 %v5776_v56, %v5317_v12 }
 0x1e9   : > { %v3050_v54 = vrot.slane %v2529_v50, %v5662_v45  ;;  %4546 = vtanh.f32 %v2165_v6  ;;  %v5817_v49 = vpop.f32.mrf.mxu0 }
 0x1ea   : > { %2831 = vadd.xlane.f32.xlu1 %v2830_v55  ;;  %v4531_v15 = vpop.eup %4530  ;;  %4548 = vtanh.f32 %v2168_v16 }
 0x1eb   : > { %2828 = vadd.xlane.f32.xlu0 %v2827_v59  ;;  %v2730_v24 = vpop.xlane.xlu1 %2729  ;;  %v3546_v63 = vsel %vm3545_vm8, %v3050_v54, %v3544_v31  ;;  %v4533_v35 = vpop.eup %4532  ;;  %v2425_v27 = vmul.f32 %v5657_v41, %v4531_v15  ;;  %4550 = vtanh.f32 %v2231_v7 }
 0x1ec   : > { %v3318_v1 = vrot.slane %v2730_v24, %v5662_v45  ;;  %v2727_v3 = vpop.xlane.xlu0 %2726  ;;  %v5784_v2 = vsel %vm3547_vm9, %v3054_v46, %v3546_v63  ;;  %v4535_v20 = vpop.eup %4534  ;;  %v2427_v17 = vmul.f32 %v5657_v41, %v4533_v35  ;;  %4552 = vtanh.f32 %v2233_v28 }
 0x1ed   : > { %v3314_v5 = vrot.slane %v2727_v3, %v5662_v45  ;;  %v4537_v30 = vpop.eup %4536  ;;  %v2644_v46 = vsel %vm2508_vm2, %v2425_v27, 0.0  ;;  %v2490_v50 = vmul.f32 %v5657_v41, %v4535_v20  ;;  %4554 = vtanh.f32 %v2167_v42  ;;  %v4285_v63 = vpop.f32.mrf.mxu1 }
 0x1ee   : > { %2639 = vadd.xlane.f32.xlu1 %v2638_v43  ;;  %v4539_v11 = vpop.eup %4538  ;;  %v2650_v59 = vsel %vm2508_vm2, %v2427_v17, 0.0  ;;  %v2493_v61 = vmul.f32 %v5657_v41, %v4537_v30  ;;  %v1758_v44 = vpop.f32.mrf.mxu0  ;;  %4556 = vtanh.f32 %v2170_v52  ;;  %v2171_v43 = vadd.f32 %v1748_v26, %v5317_v12 }
 0x1ef   : > { %v3605_v9 = vsel %vm3535_vm3, %v3318_v1, %v3314_v5  ;;  %2837 = vadd.xlane.f32.xlu0 %v2836_v14  ;;  %v2538_v13 = vpop.xlane.xlu1 %2537  ;;  %v4541_v24 = vpop.eup %4540  ;;  %v2839_v40 = vsel %vm2508_vm2, %v2490_v50, 0.0  ;;  %v2426_v1 = vmul.f32 %v5657_v41, %v4539_v11  ;;  %4558 = vtanh.f32 %v2169_v21 }
 0x1f0   : > { %v3062_v18 = vrot.slane %v2538_v13, %v5662_v45  ;;  %v2535_v60 = vpop.xlane.xlu0 %2534  ;;  %v4543_v3 = vpop.eup %4542  ;;  %v2172_v5 = vadd.f32 %v5791_v29, %v5317_v12  ;;  %v2848_v14 = vsel %vm2508_vm2, %v2493_v61, 0.0  ;;  %v2429_v4 = vmul.f32 %v5657_v41, %v4541_v24 }
 0x1f1   : > { %v3058_v22 = vrot.slane %v2535_v60, %v5662_v45  ;;  %v4545_v15 = vpop.eup %4544  ;;  %v4192_v13 = vpop.f32.mrf.mxu0  ;;  %v2492_v60 = vmul.f32 %v5657_v41, %v4543_v3  ;;  %v2238_v7 = vadd.f32 %v4285_v63, %v5317_v12  ;;  %v2174_v17 = vadd.f32 %v5817_v49, %v5317_v12 }
 0x1f2   : > { %2834 = vadd.xlane.f32.xlu1 %v2833_v19  ;;  %4560 = vtanh.f32 %v2172_v5 }
 0x1f3   : > { %v3549_v31 = vsel %vm3535_vm3, %v3062_v18, %v3058_v22  ;;  %2636 = vadd.xlane.f32.xlu0 %v2635_v0  ;;  %v2736_v33 = vpop.xlane.xlu1 %2735  ;;  %v2647_v18 = vsel %vm2508_vm2, %v2426_v1, 0.0  ;;  %4562 = vtanh.f32 %v2171_v43  ;;  %v2845_v30 = vsel %vm2508_vm2, %v2492_v60, 0.0 }
 0x1f4   : > { %v3326_v34 = vrot.slane %v2736_v33, %v5662_v45  ;;  %v2733_v32 = vpop.xlane.xlu0 %2732  ;;  %v2656_v33 = vsel %vm2508_vm2, %v2429_v4, 0.0  ;;  %4564 = vtanh.f32 %v2238_v7 }
 0x1f5   : > { %v3322_v39 = vrot.slane %v2733_v32, %v5662_v45 }
 0x1f6   : > { %2642 = vadd.xlane.f32.xlu1 %v2641_v37  ;;  %v4547_v35 = vpop.eup %4546 }
 0x1f7   : > { %v3606_v54 = vsel %vm3537_vm4, %v3322_v39, %v3605_v9  ;;  %2645 = vadd.xlane.f32.xlu0 %v2644_v46  ;;  %v2544_v55 = vpop.xlane.xlu1 %2543  ;;  %v2078_v9 = vpop.f32.mrf.mxu1  ;;  %v2428_v28 = vmul.f32 %v5657_v41, %v4547_v35 }
 0x1f8   : > { %v2742_v53 = vpop.xlane.xlu0 %2741  ;;  %v3607_v57 = vsel %vm3539_vm5, %v3326_v34, %v3606_v54  ;;  %v3070_v16 = vrot.slane %v2544_v55, %v5662_v45  ;;  %v4549_v27 = vpop.eup %4548  ;;  %v2237_v20 = vadd.f32 %v2078_v9, %v5317_v12  ;;  %v2495_v34 = vmul.f32 %v5657_v41, %v4545_v15 }
 0x1f9   : > { %v3334_v6 = vrot.slane %v2742_v53, %v5662_v45  ;;  %v5850_v32 = vpop.f32.mrf.mxu1  ;;  %v4551_v39 = vpop.eup %4550  ;;  %v2431_v11 = vmul.f32 %v5657_v41, %v4549_v27  ;;  %v2173_v55 = vadd.f32 %v1758_v44, %v5317_v12 }
 0x1fa   : > { %2651 = vadd.xlane.f32.xlu1 %v2650_v59  ;;  %4566 = vtanh.f32 %v2237_v20  ;;  %v2854_v50 = vsel %vm2508_vm2, %v2495_v34, 0.0  ;;  %v4553_v52 = vpop.eup %4552  ;;  %v2494_v49 = vmul.f32 %v5657_v41, %v4551_v39  ;;  %v2234_v20 = vadd.f32 %v5774_v58, %v5317_v12 }
 0x1fb   : > { %2840 = vadd.xlane.f32.xlu0 %v2839_v40  ;;  %v2739_v56 = vpop.xlane.xlu1 %2738  ;;  %v2088_v54 = vpop.f32.mrf.mxu1  ;;  %4568 = vtanh.f32 %v2174_v17  ;;  %v2176_v40 = vadd.f32 %v4192_v13, %v5317_v12  ;;  %v2662_v43 = vsel %vm2508_vm2, %v2431_v11, 0.0  ;;  %v2240_v58 = vadd.f32 %v5850_v32, %v5317_v12 }
 0x1fc   : > { %v3330_v48 = vrot.slane %v2739_v56, %v5662_v45  ;;  %v2541_v62 = vpop.xlane.xlu0 %2540  ;;  %v4555_v59 = vpop.eup %4554  ;;  %v2239_v56 = vadd.f32 %v2088_v54, %v5317_v12  ;;  %4570 = vtanh.f32 %v2173_v55 }
 0x1fd   : > { %v3066_v8 = vrot.slane %v2541_v62, %v5662_v45  ;;  %v4557_v63 = vpop.eup %4556  ;;  %4572 = vtanh.f32 %v2176_v40 }
 0x1fe   : > { %v3608_v29 = vsel %vm3541_vm6, %v3330_v48, %v3607_v57  ;;  %2849 = vadd.xlane.f32.xlu1 %v2848_v14  ;;  %v2653_v57 = vsel %vm2508_vm2, %v2428_v28, 0.0  ;;  %v4559_v3 = vpop.eup %4558  ;;  %v2496_v48 = vmul.f32 %v5657_v41, %v4553_v52  ;;  %v2430_v14 = vmul.f32 %v5657_v41, %v4555_v59 }
 0x1ff   : > { %v3550_v22 = vsel %vm3537_vm4, %v3066_v8, %v3549_v31  ;;  %2648 = vadd.xlane.f32.xlu0 %v2647_v18  ;;  %v2748_v19 = vpop.xlane.xlu1 %2747  ;;  %v3609_v23 = vsel %vm3543_vm7, %v3334_v6, %v3608_v29  ;;  %v1768_v31 = vpop.f32.mrf.mxu0  ;;  %v2851_v8 = vsel %vm2508_vm2, %v2494_v49, 0.0  ;;  %v2432_v60 = vmul.f32 %v5657_v41, %v4559_v3 }
 0x200   : > { %v2550_v26 = vpop.xlane.xlu0 %2549  ;;  %v3551_v0 = vsel %vm3539_vm5, %v3070_v16, %v3550_v22  ;;  %v3342_v6 = vrot.slane %v2748_v19, %v5662_v45  ;;  %v2857_v18 = vsel %vm2508_vm2, %v2496_v48, 0.0  ;;  %v4561_v35 = vpop.eup %4560  ;;  %4574 = vtanh.f32 %v2239_v56 }
 0x201   : > { %v4195_v21 = vpop.f32.mrf.mxu0  ;;  %v3078_v53 = vrot.slane %v2550_v26, %v5662_v45  ;;  %v2175_v22 = vadd.f32 %v1768_v31, %v5317_v12  ;;  %v2659_v19 = vsel %vm2508_vm2, %v2430_v14, 0.0  ;;  %v4563_v7 = vpop.eup %4562  ;;  %v2228_v26 = vadd.f32 %v5686_v10, %v5317_v12 }
 0x202   : > { %2657 = vadd.xlane.f32.xlu1 %v2656_v33  ;;  %v4565_v34 = vpop.eup %4564  ;;  %v4291_v31 = vpop.f32.mrf.mxu1  ;;  %v2435_v28 = vmul.f32 %v5657_v41, %v4561_v35  ;;  %v2178_v10 = vadd.f32 %v4195_v21, %v5317_v12 }
 0x203   : > { %2846 = vadd.xlane.f32.xlu0 %v2845_v30  ;;  %v5854_v37 = vpop.xlane.xlu1 %2555  ;;  %v1778_v62 = vpop.f32.mrf.mxu0  ;;  %v2665_v30 = vsel %vm2508_vm2, %v2432_v60, 0.0  ;;  %v2501_v11 = vmul.f32 %v5657_v41, %v4565_v34  ;;  %v2236_v60 = vadd.f32 %v5803_v25, %v5317_v12  ;;  %v2242_v35 = vadd.f32 %v4291_v31, %v5317_v12 }
 0x204   : > { %v2547_v42 = vpop.xlane.xlu0 %2546  ;;  %v2177_v16 = vadd.f32 %v1778_v62, %v5317_v12  ;;  %v2098_v54 = vpop.f32.mrf.mxu1 }
 0x205   : > { %v3074_v46 = vrot.slane %v2547_v42, %v5662_v45  ;;  %v2434_v42 = vmul.f32 %v5657_v41, %v4563_v7 }
 0x206   : > { %2855 = vadd.xlane.f32.xlu1 %v2854_v50  ;;  %4576 = vtanh.f32 %v2177_v16  ;;  %v4294_v48 = vpop.f32.mrf.mxu1 }
 0x207   : > { %v3552_v61 = vsel %vm3541_vm6, %v3074_v46, %v3551_v0  ;;  %2654 = vadd.xlane.f32.xlu0 %v2653_v57  ;;  %v5866_v24 = vpop.xlane.xlu1 %2753  ;;  %v4567_v39 = vpop.eup %4566  ;;  %4578 = vtanh.f32 %v2175_v22  ;;  %v2671_v32 = vsel %vm2508_vm2, %v2434_v42, 0.0 }
 0x208   : > { %v2745_v1 = vpop.xlane.xlu0 %2744  ;;  %v3553_v44 = vsel %vm3543_vm7, %v3078_v53, %v3552_v61  ;;  %4580 = vtanh.f32 %v2228_v26  ;;  %v4569_v52 = vpop.eup %4568  ;;  %v2674_v53 = vsel %vm2508_vm2, %v2435_v28, 0.0  ;;  %v2500_v57 = vmul.f32 %v5657_v41, %v4567_v39 }
 0x209   : > { %v3338_v5 = vrot.slane %v2745_v1, %v5662_v45  ;;  %4582 = vtanh.f32 %v2234_v20  ;;  %v4571_v59 = vpop.eup %4570  ;;  %v2235_v61 = vadd.f32 %v5815_v47, %v5317_v12  ;;  %v2241_v1 = vadd.f32 %v2098_v54, %v5317_v12  ;;  %v2108_v7 = vpop.f32.mrf.mxu1 }
 0x20a   : > { %2663 = vadd.xlane.f32.xlu1 %v2662_v43  ;;  %4584 = vtanh.f32 %v2178_v10  ;;  %v4573_v43 = vpop.eup %4572  ;;  %v2244_v28 = vadd.f32 %v4294_v48, %v5317_v12  ;;  %v2243_v42 = vadd.f32 %v2108_v7, %v5317_v12 }
 0x20b   : > { %2852 = vadd.xlane.f32.xlu0 %v2851_v8  ;;  %v2562_v4 = vpop.xlane.xlu1 %2561  ;;  %v3610_v15 = vsel %vm3545_vm8, %v3338_v5, %v3609_v23  ;;  %v2433_v23 = vmul.f32 %v5657_v41, %v4557_v63  ;;  %4586 = vtanh.f32 %v2240_v58  ;;  %v2872_v5 = vsel %vm2508_vm2, %v2501_v11, 0.0 }
 0x20c   : > { %v2553_v9 = vpop.xlane.xlu0 %2552  ;;  %v5879_v13 = vsel %vm3547_vm9, %v3342_v6, %v3610_v15  ;;  %v3094_v55 = vrot.slane %v2562_v4, %v5662_v45  ;;  %v2869_v6 = vsel %vm2508_vm2, %v2500_v57, 0.0  ;;  %v2437_v8 = vmul.f32 %v5657_v41, %v4569_v52 }
 0x20d   : > { %v3082_v29 = vrot.slane %v2553_v9, %v5662_v45  ;;  %v2668_v17 = vsel %vm2508_vm2, %v2433_v23, 0.0  ;;  %v2436_v15 = vmul.f32 %v5657_v41, %v4571_v59  ;;  %v4575_v9 = vpop.eup %4574  ;;  %4588 = vtanh.f32 %v2241_v1 }
 0x20e   : > { %2858 = vadd.xlane.f32.xlu1 %v2857_v18  ;;  %v2439_v20 = vmul.f32 %v5657_v41, %v4573_v43  ;;  %4590 = vtanh.f32 %v2235_v61  ;;  %v2502_v31 = vmul.f32 %v5657_v41, %v4575_v9 }
 0x20f   : > { %2660 = vadd.xlane.f32.xlu0 %v2659_v19  ;;  %v5890_v0 = vpop.xlane.xlu1 %2759  ;;  %v5893_v27 = vsel %vm3545_vm8, %v3082_v29, %v3553_v44  ;;  %v3350_v44 = vrot.slane %v5866_v24, %v5662_v45  ;;  %v2677_v25 = vsel %vm2508_vm2, %v2436_v15, 0.0  ;;  %4592 = vtanh.f32 %v2242_v35 }
 0x210   : > { %v2751_v33 = vpop.xlane.xlu0 %2750  ;;  %v3358_v24 = vrot.slane %v5890_v0, %v5662_v45  ;;  %v2680_v0 = vsel %vm2508_vm2, %v2437_v8, 0.0  ;;  %4594 = vtanh.f32 %v2236_v60  ;;  %v2875_v52 = vsel %vm2508_vm2, %v2502_v31, 0.0 }
 0x211   : > { %v3346_v49 = vrot.slane %v2751_v33, %v5662_v45  ;;  %4596 = vtanh.f32 %v2244_v28 }
 0x212   : > { %2666 = vadd.xlane.f32.xlu1 %v2665_v30  ;;  %4598 = vtanh.f32 %v2243_v42 }
 0x213   : > { %2669 = vadd.xlane.f32.xlu0 %v2668_v17  ;;  %v2568_v46 = vpop.xlane.xlu1 %2567  ;;  %v3612_v14 = vsel %vm3535_vm3, %v3350_v44, %v3346_v49  ;;  %v4577_v33 = vpop.eup %4576 }
 0x214   : > { %v2559_v50 = vpop.xlane.xlu0 %2558  ;;  %v3102_v62 = vrot.slane %v2568_v46, %v5662_v45  ;;  %v4579_v30 = vpop.eup %4578  ;;  %v2440_v11 = vmul.f32 %v5657_v41, %v4577_v33 }
 0x215   : > { %v3090_v21 = vrot.slane %v2559_v50, %v5662_v45  ;;  %v4581_v17 = vpop.eup %4580  ;;  %v2686_v50 = vsel %vm2508_vm2, %v2439_v20, 0.0  ;;  %v2438_v54 = vmul.f32 %v5657_v41, %v4579_v30 }
 0x216   : > { %2675 = vadd.xlane.f32.xlu1 %v2674_v53  ;;  %v4583_v46 = vpop.eup %4582  ;;  %v2689_v59 = vsel %vm2508_vm2, %v2440_v11, 0.0  ;;  %v2491_v61 = vmul.f32 %v5657_v41, %v4581_v17 }
 0x217   : > { %v3556_v63 = vsel %vm3535_vm3, %v3094_v55, %v3090_v21  ;;  %2672 = vadd.xlane.f32.xlu0 %v2671_v32  ;;  %v2565_v40 = vpop.xlane.xlu1 %2564  ;;  %v4585_v55 = vpop.eup %4584  ;;  %v2683_v1 = vsel %vm2508_vm2, %v2438_v54, 0.0 }
 0x218   : > { %v2757_v3 = vpop.xlane.xlu0 %2756  ;;  %v3098_v56 = vrot.slane %v2565_v40, %v5662_v45  ;;  %v4587_v53 = vpop.eup %4586  ;;  %v2441_v44 = vmul.f32 %v5657_v41, %v4585_v55 }
 0x219   : > { %v3354_v47 = vrot.slane %v2757_v3, %v5662_v45  ;;  %v2503_v8 = vmul.f32 %v5657_v41, %v4587_v53 }
 0x21a   : > { %v3557_v4 = vsel %vm3537_vm4, %v3098_v56, %v3556_v63  ;;  %2873 = vadd.xlane.f32.xlu1 %v2872_v5 }
 0x21b   : > { %v3613_v16 = vsel %vm3537_vm4, %v3354_v47, %v3612_v14  ;;  %2870 = vadd.xlane.f32.xlu0 %v2869_v6  ;;  %v2763_v29 = vpop.xlane.xlu1 %2762  ;;  %v3558_v18 = vsel %vm3539_vm5, %v3102_v62, %v3557_v4  ;;  %v2842_v6 = vsel %vm2508_vm2, %v2491_v61, 0.0  ;;  %v4589_v14 = vpop.eup %4588  ;;  %v2497_v4 = vmul.f32 %v5657_v41, %v4583_v46 }
 0x21c   : > { %v2766_v22 = vpop.xlane.xlu0 %2765  ;;  %v3614_v19 = vsel %vm3539_vm5, %v3358_v24, %v3613_v16  ;;  %v3362_v23 = vrot.slane %v2763_v29, %v5662_v45  ;;  %v2692_v24 = vsel %vm2508_vm2, %v2441_v44, 0.0  ;;  %v4591_v15 = vpop.eup %4590 }
 0x21d   : > { %v3366_v26 = vrot.slane %v2766_v22, %v5662_v45  ;;  %v2878_v22 = vsel %vm2508_vm2, %v2503_v8, 0.0  ;;  %v2860_v7 = vsel %vm2508_vm2, %v2497_v4, 0.0 }
 0x21e   : > { %v3615_v34 = vsel %vm3541_vm6, %v3362_v23, %v3614_v19  ;;  %2681 = vadd.xlane.f32.xlu1 %v2680_v0  ;;  %v2504_v19 = vmul.f32 %v5657_v41, %v4589_v14  ;;  %v4593_v23 = vpop.eup %4592 }
 0x21f   : > { %2678 = vadd.xlane.f32.xlu0 %v2677_v25  ;;  %v2772_v39 = vpop.xlane.xlu1 %2771  ;;  %v3616_v10 = vsel %vm3543_vm7, %v3366_v26, %v3615_v34  ;;  %v2498_v26 = vmul.f32 %v5657_v41, %v4591_v15  ;;  %v4595_v0 = vpop.eup %4594  ;;  %v2505_v28 = vmul.f32 %v5657_v41, %v4593_v23 }
 0x220   : > { %v2574_v58 = vpop.xlane.xlu0 %2573  ;;  %v3374_v63 = vrot.slane %v2772_v39, %v5662_v45  ;;  %v4597_v34 = vpop.eup %4596  ;;  %v2881_v30 = vsel %vm2508_vm2, %v2504_v19, 0.0 }
 0x221   : > { %v3110_v49 = vrot.slane %v2574_v58, %v5662_v45  ;;  %v4599_v31 = vpop.eup %4598  ;;  %v2863_v39 = vsel %vm2508_vm2, %v2498_v26, 0.0  ;;  %v2507_v11 = vmul.f32 %v5657_v41, %v4597_v34 }
 0x222   : > { %2687 = vadd.xlane.f32.xlu1 %v2686_v50  ;;  %v2884_v50 = vsel %vm2508_vm2, %v2505_v28, 0.0  ;;  %v2506_v54 = vmul.f32 %v5657_v41, %v4599_v31 }
 0x223   : > { %2876 = vadd.xlane.f32.xlu0 %v2875_v52  ;;  %v2571_v21 = vpop.xlane.xlu1 %2570 }
 0x224   : > { %v2769_v12 = vpop.xlane.xlu0 %2768  ;;  %v3106_v57 = vrot.slane %v2571_v21, %v5662_v45 }
 0x225   : > { %v3370_v32 = vrot.slane %v2769_v12, %v5662_v45 }
 0x226   : > { %v3559_v40 = vsel %vm3541_vm6, %v3106_v57, %v3558_v18  ;;  %2690 = vadd.xlane.f32.xlu1 %v2689_v59  ;;  %v2890_v57 = vsel %vm2508_vm2, %v2507_v11, 0.0 }
 0x227   : > { %2684 = vadd.xlane.f32.xlu0 %v2683_v1  ;;  %v2580_v3 = vpop.xlane.xlu1 %2579  ;;  %v3560_v56 = vsel %vm3543_vm7, %v3110_v49, %v3559_v40  ;;  %v3617_v5 = vsel %vm3545_vm8, %v3370_v32, %v3616_v10  ;;  %v2499_v10 = vmul.f32 %v5657_v41, %v4595_v0  ;;  %v2887_v49 = vsel %vm2508_vm2, %v2506_v54, 0.0 }
 0x228   : > { %v3118_v43 = vrot.slane %v2580_v3, %v5662_v45  ;;  %v2577_v48 = vpop.xlane.xlu0 %2576  ;;  %v5961_v62 = vsel %vm3547_vm9, %v3374_v63, %v3617_v5 }
 0x229   : > { %v3114_v47 = vrot.slane %v2577_v48, %v5662_v45  ;;  %v2866_v52 = vsel %vm2508_vm2, %v2499_v10, 0.0 }
 0x22a   : > { %2843 = vadd.xlane.f32.xlu1 %v2842_v6 }
 0x22b   : > { %2693 = vadd.xlane.f32.xlu0 %v2692_v24  ;;  %v2778_v9 = vpop.xlane.xlu1 %2777  ;;  %v3561_v16 = vsel %vm3545_vm8, %v3114_v47, %v3560_v56 }
 0x22c   : > { %v3382_v29 = vrot.slane %v2778_v9, %v5662_v45  ;;  %v2775_v18 = vpop.xlane.xlu0 %2774  ;;  %v5971_v60 = vsel %vm3547_vm9, %v3118_v43, %v3561_v16 }
 0x22d   : > { %v3378_v35 = vrot.slane %v2775_v18, %v5662_v45 }
 0x22e   : > { %2879 = vadd.xlane.f32.xlu1 %v2878_v22 }
 0x22f   : > { %v3619_v20 = vsel %vm3535_vm3, %v3382_v29, %v3378_v35  ;;  %2861 = vadd.xlane.f32.xlu0 %v2860_v7  ;;  %v5979_v33 = vpop.xlane.xlu1 %2585 }
 0x230   : > { %v5981_v25 = vpop.xlane.xlu0 %2582 }
 0x232   : > { %2882 = vadd.xlane.f32.xlu1 %v2881_v30 }
 0x233   : > { %2864 = vadd.xlane.f32.xlu0 %v2863_v39  ;;  %v2784_v17 = vpop.xlane.xlu1 %2783 }
 0x234   : > { %v3390_v42 = vrot.slane %v2784_v17, %v5662_v45  ;;  %v2781_v58 = vpop.xlane.xlu0 %2780 }
 0x235   : > { %v3386_v46 = vrot.slane %v2781_v58, %v5662_v45  ;;  %v3122_v58 = vrot.slane %v5981_v25, %v5662_v45 }
 0x236   : > { %2885 = vadd.xlane.f32.xlu1 %v2884_v50 }
 0x237   : > { %v3620_v55 = vsel %vm3537_vm4, %v3386_v46, %v3619_v20  ;;  %2867 = vadd.xlane.f32.xlu0 %v2866_v52  ;;  %v5994_v21 = vpop.xlane.xlu1 %2591 }
 0x238   : > { %v2790_v53 = vpop.xlane.xlu0 %2789  ;;  %v3621_v12 = vsel %vm3539_vm5, %v3390_v42, %v3620_v55  ;;  %v3126_v42 = vrot.slane %v5979_v33, %v5662_v45 }
 0x239   : > { %v3398_v41 = vrot.slane %v2790_v53, %v5662_v45 }
 0x23a   : > { %2891 = vadd.xlane.f32.xlu1 %v2890_v57  ;;  %v3563_v52 = vsel %vm3535_vm3, %v3126_v42, %v3122_v58 }
 0x23b   : > { %2888 = vadd.xlane.f32.xlu0 %v2887_v49  ;;  %v2787_v32 = vpop.xlane.xlu1 %2786 }
 0x23c   : > { %v3394_v59 = vrot.slane %v2787_v32, %v5662_v45  ;;  %v2589_v61 = vpop.xlane.xlu0 %2588  ;;  %v3134_v32 = vrot.slane %v5994_v21, %v5662_v45 }
 0x23d   : > { %v3130_v46 = vrot.slane %v2589_v61, %v5662_v45 }
 0x23e   : > { %v3622_v63 = vsel %vm3541_vm6, %v3394_v59, %v3621_v12 }
 0x23f   : > { %v2796_v40 = vpop.xlane.xlu1 %2795  ;;  %v3623_v1 = vsel %vm3543_vm7, %v3398_v41, %v3622_v63  ;;  %v3564_v55 = vsel %vm3537_vm4, %v3130_v46, %v3563_v52  ;;  %v3086_v63 = vrot.slane %v5854_v37, %v5662_v45 }
 0x240   : > { %v6003_v44 = vpop.xlane.xlu0 %2597  ;;  %v3406_v43 = vrot.slane %v2796_v40, %v5662_v45  ;;  %v3565_v40 = vsel %vm3539_vm5, %v3134_v32, %v3564_v55 }
 0x241   : > { %v3555_v21 = vsel %vm3547_vm9, %v3086_v63, %v5893_v27 }
 0x243   : > { %v2595_v3 = vpop.xlane.xlu1 %2594 }
 0x244   : > { %v2793_v56 = vpop.xlane.xlu0 %2792  ;;  %v3138_v12 = vrot.slane %v2595_v3, %v5662_v45 }
 0x245   : > { %v3402_v5 = vrot.slane %v2793_v56, %v5662_v45 }
 0x247   : > { %v6007_v48 = vpop.xlane.xlu1 %2603  ;;  %v3624_v47 = vsel %vm3545_vm8, %v3402_v5, %v3623_v1  ;;  %v3566_v1 = vsel %vm3541_vm6, %v3138_v12, %v3565_v40 }
 0x248   : > { %v6010_v6 = vpop.xlane.xlu0 %2600  ;;  %v6013_v8 = vsel %vm3547_vm9, %v3406_v43, %v3624_v47  ;;  %v3150_v27 = vrot.slane %v6007_v48, %v5662_v45 }
 0x249   : > { %v3146_v5 = vrot.slane %v6010_v6, %v5662_v45 }
 0x24b   : > { %v2802_v14 = vpop.xlane.xlu1 %2801 }
 0x24c   : > { %v3414_v24 = vrot.slane %v2802_v14, %v5662_v45  ;;  %v2799_v4 = vpop.xlane.xlu0 %2798  ;;  %v3142_v14 = vrot.slane %v6003_v44, %v5662_v45 }
 0x24d   : > { %v3410_v15 = vrot.slane %v2799_v4, %v5662_v45 }
 0x24f   : > { %v3626_v9 = vsel %vm3535_vm3, %v3414_v24, %v3410_v15  ;;  %v2610_v16 = vpop.xlane.xlu1 %2609 }
 0x250   : > { %v2607_v29 = vpop.xlane.xlu0 %2606  ;;  %v3158_v57 = vrot.slane %v2610_v16, %v5662_v45  ;;  %v3567_v16 = vsel %vm3543_vm7, %v3142_v14, %v3566_v1 }
 0x251   : > { %v3154_v33 = vrot.slane %v2607_v29, %v5662_v45  ;;  %v3568_v44 = vsel %vm3545_vm8, %v3146_v5, %v3567_v16 }
 0x253   : > { %v2808_v18 = vpop.xlane.xlu1 %2807  ;;  %v3570_v3 = vsel %vm3535_vm3, %v3158_v57, %v3154_v33 }
 0x254   : > { %v3422_v35 = vrot.slane %v2808_v18, %v5662_v45  ;;  %v2805_v22 = vpop.xlane.xlu0 %2804 }
 0x255   : > { %v3418_v19 = vrot.slane %v2805_v22, %v5662_v45 }
 0x257   : > { %v3627_v23 = vsel %vm3537_vm4, %v3418_v19, %v3626_v9  ;;  %v2616_v7 = vpop.xlane.xlu1 %2615 }
 0x258   : > { %v2814_v26 = vpop.xlane.xlu0 %2813  ;;  %v3628_v0 = vsel %vm3539_vm5, %v3422_v35, %v3627_v23  ;;  %v3166_v24 = vrot.slane %v2616_v7, %v5662_v45  ;;  %v3569_v23 = vsel %vm3547_vm9, %v3150_v27, %v3568_v44 }
 0x259   : > { %v3430_v30 = vrot.slane %v2814_v26, %v5662_v45 }
 0x25b   : > { %v2811_v20 = vpop.xlane.xlu1 %2810 }
 0x25c   : > { %v3426_v34 = vrot.slane %v2811_v20, %v5662_v45  ;;  %v2613_v31 = vpop.xlane.xlu0 %2612 }
 0x25d   : > { %v3162_v59 = vrot.slane %v2613_v31, %v5662_v45 }
 0x25e   : > { %v3629_v28 = vsel %vm3541_vm6, %v3426_v34, %v3628_v0 }
 0x25f   : > { %v2820_v39 = vpop.xlane.xlu1 %2819  ;;  %v3630_v10 = vsel %vm3543_vm7, %v3430_v30, %v3629_v28 }
 0x260   : > { %v2622_v17 = vpop.xlane.xlu0 %2621  ;;  %v3438_v53 = vrot.slane %v2820_v39, %v5662_v45 }
 0x261   : > { %v3174_v22 = vrot.slane %v2622_v17, %v5662_v45 }
 0x263   : > { %v2619_v50 = vpop.xlane.xlu1 %2618 }
 0x264   : > { %v2817_v11 = vpop.xlane.xlu0 %2816  ;;  %v3170_v43 = vrot.slane %v2619_v50, %v5662_v45 }
 0x265   : > { %v3434_v54 = vrot.slane %v2817_v11, %v5662_v45 }
 0x267   : > { %v2628_v49 = vpop.xlane.xlu1 %2627  ;;  %v3631_v25 = vsel %vm3545_vm8, %v3434_v54, %v3630_v10 }
 0x268   : > { %v2625_v61 = vpop.xlane.xlu0 %2624  ;;  %3670 = vxpose.xlu0.b32.start [1/16] (narrow) %v5784_v2, 8  ;;  %v6044_v41 = vsel %vm3547_vm9, %v3438_v53, %v3631_v25  ;;  %v3571_v2 = vsel %vm3537_vm4, %v3162_v59, %v3570_v3  ;;  %v3182_v48 = vrot.slane %v2628_v49, %v5662_v45 }
 0x269   : > { %v3572_v6 = vsel %vm3539_vm5, %v3166_v24, %v3571_v2  ;;  %v3178_v18 = vrot.slane %v2625_v61, %v5662_v45 }
 0x26a   : > { %v3573_v29 = vsel %vm3541_vm6, %v3170_v43, %v3572_v6 }
 0x26b   : > { %v2826_v56 = vpop.xlane.xlu1 %2825  ;;  %v3574_v7 = vsel %vm3543_vm7, %v3174_v22, %v3573_v29 }
 0x26c   : > { %v3446_v47 = vrot.slane %v2826_v56, %v5662_v45  ;;  %v2823_v37 = vpop.xlane.xlu0 %2822  ;;  %3671 = vxpose.xlu0.b32.cont [2/16] (narrow) %v3555_v21, 8  ;;  %v3575_v20 = vsel %vm3545_vm8, %v3178_v18, %v3574_v7 }
 0x26d   : > { %v3442_v4 = vrot.slane %v2823_v37, %v5662_v45  ;;  %v3576_v30 = vsel %vm3547_vm9, %v3182_v48, %v3575_v20 }
 0x26f   : > { %v3633_v15 = vsel %vm3535_vm3, %v3446_v47, %v3442_v4  ;;  %v2634_v9 = vpop.xlane.xlu1 %2633 }
 0x270   : > { %v2631_v35 = vpop.xlane.xlu0 %2630  ;;  %3672 = vxpose.xlu0.b32.cont [3/16] (narrow) %v5971_v60, 8  ;;  %v3190_v46 = vrot.slane %v2634_v9, %v5662_v45 }
 0x271   : > { %v3186_v50 = vrot.slane %v2631_v35, %v5662_v45 }
 0x273   : > { %v2832_v19 = vpop.xlane.xlu1 %2831  ;;  %v3577_v12 = vsel %vm3535_vm3, %v3190_v46, %v3186_v50 }
 0x274   : > { %v3454_v26 = vrot.slane %v2832_v19, %v5662_v45  ;;  %v2829_v0 = vpop.xlane.xlu0 %2828  ;;  %3673 = vxpose.xlu0.b32.cont [4/16] (narrow) %v3569_v23, 8 }
 0x275   : > { %v3450_v34 = vrot.slane %v2829_v0, %v5662_v45 }
 0x277   : > { %v3634_v60 = vsel %vm3537_vm4, %v3450_v34, %v3633_v15  ;;  %v2640_v31 = vpop.xlane.xlu1 %2639 }
 0x278   : > { %v2838_v28 = vpop.xlane.xlu0 %2837  ;;  %3674 = vxpose.xlu0.b32.cont [5/16] (narrow) %v3576_v30, 8  ;;  %v3635_v39 = vsel %vm3539_vm5, %v3454_v26, %v3634_v60  ;;  %v3198_v25 = vrot.slane %v2640_v31, %v5662_v45 }
 0x279   : > { %v3462_v58 = vrot.slane %v2838_v28, %v5662_v45 }
 0x27b   : > { %v2835_v10 = vpop.xlane.xlu1 %2834 }
 0x27c   : > { %v3458_v17 = vrot.slane %v2835_v10, %v5662_v45  ;;  %v2637_v42 = vpop.xlane.xlu0 %2636 }
 0x27d   : > { %v3194_v52 = vrot.slane %v2637_v42, %v5662_v45 }
 0x27e   : > { %v3636_v11 = vsel %vm3541_vm6, %v3458_v17, %v3635_v39 }
 0x27f   : > { %v2643_v54 = vpop.xlane.xlu1 %2642  ;;  %v3637_v55 = vsel %vm3543_vm7, %v3462_v58, %v3636_v11  ;;  %v3578_v57 = vsel %vm3537_vm4, %v3194_v52, %v3577_v12 }
 0x280   : > { %v2646_v53 = vpop.xlane.xlu0 %2645  ;;  %v3202_v33 = vrot.slane %v2643_v54, %v5662_v45  ;;  %v3579_v63 = vsel %vm3539_vm5, %v3198_v25, %v3578_v57 }
 0x281   : > { %v3206_v61 = vrot.slane %v2646_v53, %v5662_v45 }
 0x282   : > { %v3580_v40 = vsel %vm3541_vm6, %v3202_v33, %v3579_v63 }
 0x283   : > { %v2652_v49 = vpop.xlane.xlu1 %2651  ;;  %v3581_v2 = vsel %vm3543_vm7, %v3206_v61, %v3580_v40 }
 0x284   : > { %v2841_v32 = vpop.xlane.xlu0 %2840  ;;  %v3214_v5 = vrot.slane %v2652_v49, %v5662_v45 }
 0x285   : > { %v3466_v59 = vrot.slane %v2841_v32, %v5662_v45 }
 0x287   : > { %v2850_v1 = vpop.xlane.xlu1 %2849  ;;  %v6097_v3 = vsel %vm3545_vm8, %v3466_v59, %v3637_v55 }
 0x288   : > { %v2649_v56 = vpop.xlane.xlu0 %2648  ;;  %v3478_v24 = vrot.slane %v2850_v1, %v5662_v45 }
 0x289   : > { %v3210_v21 = vrot.slane %v2649_v56, %v5662_v45  ;;  %v3274_v56 = vrot.slane %v5650_v38, %v5662_v45 }
 0x28b   : > { %v2658_v43 = vpop.xlane.xlu1 %2657  ;;  %v3582_v47 = vsel %vm3545_vm8, %v3210_v21, %v3581_v2  ;;  %v3278_v21 = vrot.slane %v5647_v36, %v5662_v45 }
 0x28c   : > { %v2847_v37 = vpop.xlane.xlu0 %2846  ;;  %v3583_v14 = vsel %vm3547_vm9, %v3214_v5, %v3582_v47  ;;  %v3222_v35 = vrot.slane %v2658_v43, %v5662_v45 }
 0x28d   : > { %v3474_v4 = vrot.slane %v2847_v37, %v5662_v45  ;;  %3675 = vxpose.xlu0.b32.cont [6/16] (narrow) %v3583_v14, 8 }
 0x28f   : > { %v6107_v27 = vsel %vm3535_vm3, %v3478_v24, %v3474_v4  ;;  %v6109_v6 = vpop.xlane.xlu1 %2855 }
 0x290   : > { %v2655_v15 = vpop.xlane.xlu0 %2654 }
 0x291   : > { %v3218_v29 = vrot.slane %v2655_v15, %v5662_v45 }
 0x293   : > { %v2664_v9 = vpop.xlane.xlu1 %2663  ;;  %v3584_v48 = vsel %vm3535_vm3, %v3222_v35, %v3218_v29 }
 0x294   : > { %v2853_v16 = vpop.xlane.xlu0 %2852  ;;  %v3230_v7 = vrot.slane %v2664_v9, %v5662_v45 }
 0x295   : > { %v3482_v36 = vrot.slane %v2853_v16, %v5662_v45 }
 0x297   : > { %v6112_v18 = vpop.xlane.xlu1 %2858  ;;  %v3641_v9 = vsel %vm3537_vm4, %v3482_v36, %v6107_v27 }
 0x298   : > { %v2661_v44 = vpop.xlane.xlu0 %2660 }
 0x299   : > { %v3226_v22 = vrot.slane %v2661_v44, %v5662_v45 }
 0x29b   : > { %v3585_v19 = vsel %vm3537_vm4, %v3226_v22, %v3584_v48  ;;  %v2667_v23 = vpop.xlane.xlu1 %2666 }
 0x29c   : > { %v2670_v26 = vpop.xlane.xlu0 %2669  ;;  %v3234_v0 = vrot.slane %v2667_v23, %v5662_v45  ;;  %v3586_v34 = vsel %vm3539_vm5, %v3230_v7, %v3585_v19 }
 0x29d   : > { %v3238_v20 = vrot.slane %v2670_v26, %v5662_v45 }
 0x29e   : > { %v3587_v60 = vsel %vm3541_vm6, %v3234_v0, %v3586_v34 }
 0x29f   : > { %v2676_v31 = vpop.xlane.xlu1 %2675  ;;  %v3588_v10 = vsel %vm3543_vm7, %v3238_v20, %v3587_v60 }
 0x2a0   : > { %v3246_v30 = vrot.slane %v2676_v31, %v5662_v45  ;;  %v2673_v28 = vpop.xlane.xlu0 %2672 }
 0x2a1   : > { %v3242_v39 = vrot.slane %v2673_v28, %v5662_v45 }
 0x2a3   : > { %v2874_v17 = vpop.xlane.xlu1 %2873  ;;  %v3589_v42 = vsel %vm3545_vm8, %v3242_v39, %v3588_v10 }
 0x2a4   : > { %v2871_v58 = vpop.xlane.xlu0 %2870  ;;  %v3590_v46 = vsel %vm3547_vm9, %v3246_v30, %v3589_v42  ;;  %v3510_v29 = vrot.slane %v2874_v17, %v5662_v45 }
 0x2a5   : > { %3676 = vxpose.xlu0.b32.cont [7/16] (narrow) %v3590_v46, 8 }
 0x2a7   : > { %v2682_v50 = vpop.xlane.xlu1 %2681 }
 0x2a8   : > { %v2679_v11 = vpop.xlane.xlu0 %2678  ;;  %v3254_v55 = vrot.slane %v2682_v50, %v5662_v45 }
 0x2a9   : > { %v3250_v53 = vrot.slane %v2679_v11, %v5662_v45 }
 0x2ab   : > { %v2688_v52 = vpop.xlane.xlu1 %2687  ;;  %v3591_v49 = vsel %vm3535_vm3, %v3254_v55, %v3250_v53 }
 0x2ac   : > { %v2877_v54 = vpop.xlane.xlu0 %2876  ;;  %v3262_v25 = vrot.slane %v2688_v52, %v5662_v45 }
 0x2ad   : > { %v3514_v16 = vrot.slane %v2877_v54, %v5662_v45 }
 0x2af   : > { %v2691_v57 = vpop.xlane.xlu1 %2690 }
 0x2b0   : > { %v2685_v12 = vpop.xlane.xlu0 %2684  ;;  %v3266_v59 = vrot.slane %v2691_v57, %v5662_v45 }
 0x2b1   : > { %v3258_v33 = vrot.slane %v2685_v12, %v5662_v45 }
 0x2b3   : > { %v3592_v32 = vsel %vm3537_vm4, %v3258_v33, %v3591_v49  ;;  %v2844_v47 = vpop.xlane.xlu1 %2843 }
 0x2b4   : > { %v3593_v61 = vsel %vm3539_vm5, %v3262_v25, %v3592_v32  ;;  %v2694_v63 = vpop.xlane.xlu0 %2693  ;;  %v3470_v35 = vrot.slane %v2844_v47, %v5662_v45 }
 0x2b5   : > { %v3594_v40 = vsel %vm3541_vm6, %v3266_v59, %v3593_v61  ;;  %v3270_v1 = vrot.slane %v2694_v63, %v5662_v45 }
 0x2b7   : > { %v3595_v5 = vsel %vm3543_vm7, %v3270_v1, %v3594_v40  ;;  %v2880_v14 = vpop.xlane.xlu1 %2879 }
 0x2b8   : > { %v3596_v2 = vsel %vm3545_vm8, %v3274_v56, %v3595_v5  ;;  %v2862_v37 = vpop.xlane.xlu0 %2861  ;;  %v3518_v27 = vrot.slane %v2880_v14, %v5662_v45 }
 0x2b9   : > { %v3597_v43 = vsel %vm3547_vm9, %v3278_v21, %v3596_v2 }
 0x2ba   : > { %3677 = vxpose.xlu0.b32.cont [8/16] (narrow) %v3597_v43, 8 }
 0x2bb   : > { %v2883_v4 = vpop.xlane.xlu1 %2882 }
 0x2bc   : > { %v2865_v24 = vpop.xlane.xlu0 %2864  ;;  %v3522_v19 = vrot.slane %v2883_v4, %v5662_v45 }
 0x2bd   : > { %v3498_v48 = vrot.slane %v2865_v24, %v5662_v45 }
 0x2be   : > { %3678 = vxpose.xlu0.b32.cont [9/16] (narrow) %v5766_v51, 8  ;;  %v3506_v51 = vrot.slane %v2871_v58, %v5662_v45 }
 0x2bf   : > { %v2886_v15 = vpop.xlane.xlu1 %2885 }
 0x2c0   : > { %v2868_v38 = vpop.xlane.xlu0 %2867 }
 0x2c1   : > { %v3502_v23 = vrot.slane %v2868_v38, %v5662_v45 }
 0x2c2   : > { %3679 = vxpose.xlu0.b32.cont [10/16] (narrow) %v5879_v13, 8  ;;  %v3486_v13 = vrot.slane %v6109_v6, %v5662_v45  ;;  %v3647_v6 = vsel %vm3535_vm3, %v3510_v29, %v3506_v51 }
 0x2c3   : > { %v3648_v26 = vsel %vm3537_vm4, %v3514_v16, %v3647_v6  ;;  %v2892_v20 = vpop.xlane.xlu1 %2891 }
 0x2c4   : > { %v2889_v44 = vpop.xlane.xlu0 %2888  ;;  %v3642_v22 = vsel %vm3539_vm5, %v3486_v13, %v3641_v9  ;;  %v3649_v60 = vsel %vm3539_vm5, %v3518_v27, %v3648_v26 }
 0x2c5   : > { %v3530_v0 = vrot.slane %v2889_v44, %v5662_v45  ;;  %v3650_v31 = vsel %vm3541_vm6, %v3522_v19, %v3649_v60 }
 0x2c6   : > { %3680 = vxpose.xlu0.b32.cont [11/16] (narrow) %v5961_v62, 8  ;;  %v3490_v62 = vrot.slane %v6112_v18, %v5662_v45  ;;  %v3526_v18 = vrot.slane %v2886_v15, %v5662_v45 }
 0x2c8   : > { %v3643_v7 = vsel %vm3541_vm6, %v3490_v62, %v3642_v22  ;;  %v3651_v28 = vsel %vm3543_vm7, %v3526_v18, %v3650_v31 }
 0x2c9   : > { %v3652_v10 = vsel %vm3545_vm8, %v3530_v0, %v3651_v28 }
 0x2ca   : > { %3681 = vxpose.xlu0.b32.cont [12/16] (narrow) %v6013_v8, 8  ;;  %v3494_v8 = vrot.slane %v2862_v37, %v5662_v45 }
 0x2cc   : > { %v3644_v34 = vsel %vm3543_vm7, %v3494_v8, %v3643_v7 }
 0x2cd   : > { %v3645_v30 = vsel %vm3545_vm8, %v3498_v48, %v3644_v34 }
 0x2ce   : > { %3682 = vxpose.xlu0.b32.cont [13/16] (narrow) %v6044_v41, 8  ;;  %v3639_v41 = vsel %vm3547_vm9, %v3470_v35, %v6097_v3  ;;  %v3534_v3 = vrot.slane %v2892_v20, %v5662_v45  ;;  %v3646_v39 = vsel %vm3547_vm9, %v3502_v23, %v3645_v30 }
 0x2d0   : > { %v3653_v17 = vsel %vm3547_vm9, %v3534_v3, %v3652_v10 }
 0x2d2   : > { %3683 = vxpose.xlu0.b32.cont [14/16] (narrow) %v3639_v41, 8 }
 0x2d6   : > { %3684 = vxpose.xlu0.b32.cont [15/16] (narrow) %v3646_v39, 8 }
 0x2da   : > { %3685 = vxpose.xlu0.b32.end [16/16] (narrow) %v3653_v17, 8 }
 0x31a   : > { %v3686_v42 = vpop.trf.xlu0 }
 0x31b   : > { %3702 = vmax.xlane.f32.xlu1 %v3686_v42 }
 0x3a4   : > { %v3703_v58 = vpop.xlane.xlu1 %3702 }
 0x3a5   : > { %v3704_v46 = vsub.f32 %v3686_v42, %v3703_v58 }
 0x3a7   : > { %v3705_v50 = vmul.f32 1.442695, %v3704_v46 }
 0x3a9   : > { %4600 = vpow2.f32 %v3705_v50 }
 0x3b6   : > { %v4601_v11 = vpop.eup %4600 }
 0x3b7   : > { %3707 = vadd.xlane.f32.xlu1 %v4601_v11 }
 0x440   : > { %v3708_v45 = vpop.xlane.xlu1 %3707 }
 0x441   : > { %4602 = vrcp.f32 %v3708_v45 }
 0x44e   : > { %v4603_v52 = vpop.eup %4602 }
 0x44f   : > { %v3710_v54 = vmul.f32 %v4603_v52, %v4601_v11 }
 0x451   : > { %3711 = vst [vmem:[%s805_s19] sm:$0xff] %v3710_v54 }
 0x452   : > { %4618 = shalt.err (!%p4615_p7)
}
 0x453   : > { %s4619_s14 = scalar_lea.hbm %s3724_s9, 128  ;;  %s4623_s16 = scalar_lea.hbm %s6225_s6, 256 }
 0x454   : > { %p4620_p10 = scmp.ne.s32.totalorder %s3724_s9, %s4619_s14  ;;  %p4624_p13 = scmp.lt.s32.totalorder %s3724_s9, %s6225_s6 }
 0x455   : > { %p4625_p0 = scmp.lt.s32.totalorder %s4623_s16, %s4619_s14 }
 0x456   : > { %p4621_p11 = pnand %p4620_p10, %p4744_p6 }
 0x457   : > { %p4626_p1 = por %p4625_p0, %p4624_p13 }
 0x458   : > { %p4622_p12 = pneg %p4621_p11 }
 0x45a   : > { %p4627_p9 = pnand %p4626_p1, %p4622_p12 }
 0x45c   : > { %4630 = shalt.err (!%p4627_p9)
}
 0x45d   : > { %4303 = dma.vmem_to_hbm [thread:$0]  (%p4744_p6), %s3727_s20, 128, %s3724_s9, %s3713_s11  }
 0x45e PF: > { %s3738_s19 = sand.u32 1, %s4653_s21   ;;  %p6229_p2 = scmp.ge.s32.totalorder %s4665_s24, 2 }
 0x45f   : > { %s3739_s26 = scalar_lea.sflag [#allocation4], %s3738_s19 }
 0x460   : > { %p4306_p3 = pnand %p6229_p2, %p4748_p8 }
 0x462   : > { %p4307_p4 = pneg %p4306_p3 }
 0x464   : > { %4648 = dma.done.wait (%p4307_p4), %s3739_s26, 128  }
 0x465   : > { %4650 = vsyncadd (%p4307_p4), %s3739_s26, 4294967168  ;;  %p16_p9 = scmp.ge.s32.totalorder %s4730_s27, 4   ;;  %s6230_s21 = smov %s4657_s22 }
 0x466   : > { %s6231_s22 = smov %s4661_s23  ;;  %s6232_s23 = smov %s4742_s30 }
 0x467   : > { %s6233_s24 = smov %s4730_s27  ;;  %18 = sbr.rel (!%p16_p9) target bundleno = 3 (0x3), region = 125 }
 0x46c   :  { %3744 = vsyncpa [#allocation4], 1 }
 0x46d   :  { %3746 = vsyncpa [#allocation4 + $0x1], 1 }

</bundles_post_ra>
